<compile_context>
chip_gen: v7x
topology: tpu7x:2x2x1
jax: 0.10.0
libtpu: 0.0.40
codegen_flags: <defaults>
</compile_context>

<pallas_src>
import functools

import jax
import jax.numpy as jnp
from jax.experimental import pallas as pl
from jax.experimental.pallas import tpu as pltpu

_LANE = 128


def r4d_kernel(x_ref, w_ref, o_ref, *, T, Pp):
    # x_ref: (1, (S+2)*C, (T+2)*Pp) bf16 -- whole zero-padded sample for the
    #        current outer batch b (resident across all S inner steps).
    # w_ref: (3, C_out, 3*C_in)     bf16 -- conv taps, dt-major; K dim is
    #        (ds, c_in) merged; the residual identity is folded into the
    #        (dt=1, ds=1) block, so no separate residual pass is needed.
    # o_ref: (1, 1, C_out, T*Pp)    f32  -- output slab for (b, s); written
    #        exactly once from a value accumulator (lane-dense last dim).
    s = pl.program_id(1)
    C = o_ref.shape[2]
    TP = T * Pp

    row = s * C            # first row of the 3-segment window [s, s+3)
    if C % 16 == 0:        # bf16 packs 2 rows / sublane -> 16-row alignment
        row = pl.multiple_of(row, 16)
    elif C % 8 == 0:
        row = pl.multiple_of(row, 8)

    # One fused matmul per time tap dt: the three segment taps ds = 0..2 are
    # contiguous rows of the flattened (S+2)*C dim, giving a (3*C, T*Pp)
    # operand with zero data movement -> K = 3*C per MXU call.  Accumulate in
    # a value; store the slab once at the end.
    acc = None
    for dt in range(3):
        xs = x_ref[0, pl.ds(row, 3 * C), dt * Pp:dt * Pp + TP]   # (3C, T*Pp)
        d = jnp.dot(w_ref[dt], xs, preferred_element_type=jnp.float32)
        acc = d if acc is None else acc + d
    o_ref[0, 0] = acc


def r4d_forward(x, weight, num_segments):
    """R4D forward.

    x:      (b, c, t, h, w) float32, b divisible by num_segments.
    weight: (C_out, C_in, 3, 3, 1) -- TSA conv weight (Conv3d kernel (3,3,1),
            padding (1,1,0), no bias).
    Returns (b, c, t, h, w) float32, same semantics as R4D.forward.
    """
    b, c, t, h, w_sp = x.shape
    S = num_segments
    assert b % S == 0, "batch must be divisible by num_segments"
    B = b // S
    P = h * w_sp
    Pp = -(-P // _LANE) * _LANE           # pixels padded up to a lane multiple

    # ---- layout glue: reshapes only, no HBM transpose --------------------
    xl = x.reshape(B, S, c, t, P)
    if Pp != P:
        xl = jnp.pad(xl, ((0, 0), (0, 0), (0, 0), (0, 0), (0, Pp - P)))
    # zero-pad the two conv dims (segments, time); merge (S+2, C) into the
    # row dim and (T+2, Pp) into the lane dim; store in bf16.
    x_pad = jnp.pad(xl, ((0, 0), (1, 1), (0, 0), (1, 1), (0, 0)))
    x_pad = x_pad.reshape(B, (S + 2) * c, (t + 2) * Pp).astype(jnp.bfloat16)

    # weight (C_out, C_in, ds, dt, 1) -> (dt, C_out, ds*C_in); fold the
    # residual (identity on the centre tap dt=1, ds=1) before the bf16 cast.
    wk = jnp.transpose(weight[..., 0], (3, 0, 2, 1)).reshape(3, c, 3 * c)
    wk = wk.at[1, :, c:2 * c].add(jnp.eye(c, dtype=wk.dtype))
    wk = wk.astype(jnp.bfloat16)

    Np = (t + 2) * Pp
    TP = t * Pp

    # explicit scoped-VMEM budget: x and out double-buffered, w single-buffered
    x_block = (S + 2) * c * Np * 2                  # bf16 sample block
    w_block = 3 * c * 3 * c * 2                     # bf16 weight block
    o_block = c * TP * 4                            # f32 output slab
    vmem_need = 2 * x_block + w_block + 2 * o_block
    try:
        vmem_cap = int(pltpu.get_tpu_info().vmem_capacity_bytes)
    except Exception:                               # pragma: no cover
        vmem_cap = 64 << 20                         # conservative (v7x-sized)
    vmem_limit = int(min(max(vmem_need + (8 << 20), 32 << 20),
                         int(0.9 * vmem_cap)))

    # B-sharding is the megacore default; only expose S when B can't be split.
    sem_s = "parallel" if B == 1 else "arbitrary"

    out = pl.pallas_call(
        functools.partial(r4d_kernel, T=t, Pp=Pp),
        out_shape=jax.ShapeDtypeStruct((B, S, c, TP), jnp.float32),
        grid=(B, S),
        in_specs=[
            # whole padded sample; index constant in s -> DMA'd once per b
            pl.BlockSpec((1, (S + 2) * c, Np), lambda b_, s_: (b_, 0, 0)),
            # loop-invariant weight: single-buffered (fetched exactly once)
            pl.BlockSpec((3, c, 3 * c), lambda b_, s_: (0, 0, 0),
                         pipeline_mode=pl.Buffered(1)),
        ],
        out_specs=pl.BlockSpec((1, 1, c, TP), lambda b_, s_: (b_, s_, 0, 0)),
        compiler_params=pltpu.CompilerParams(
            dimension_semantics=("parallel", sem_s),
            vmem_limit_bytes=vmem_limit),
    )(x_pad, wk)

    # ---- back to the PyTorch layout: reshape + slice only ----------------
    out = out.reshape(B, S, c, t, Pp)[..., :P]
    return out.reshape(b, c, t, h, w_sp)


if __name__ == "__main__":
    # Small shapes consistent with the module (in_channels defaults to 1024;
    # 128 here keeps the fused contraction depth 3*C = 384 MXU-filling).
    B, S, C, T, H, W = 2, 4, 128, 2, 16, 16
    b = B * S

    key = jax.random.PRNGKey(0)
    kx, kw = jax.random.split(key)
    x = jax.random.normal(kx, (b, C, T, H, W), dtype=jnp.float32)
    # nn.Conv3d(C, C, (3, 3, 1), bias=False) weight, deterministic synthetic.
    weight = 0.05 * jax.random.normal(kw, (C, C, 3, 3, 1), dtype=jnp.float32)

    fwd = jax.jit(functools.partial(r4d_forward, num_segments=S))
    out = jax.block_until_ready(fwd(x, weight))

    # Pure-JAX f32 reference (same math as the R4D fast path: conv + residual).
    xl = jnp.transpose(x.reshape(B, S, C, T, H * W), (0, 1, 3, 4, 2))
    x_pad = jnp.pad(xl, ((0, 0), (1, 1), (1, 1), (0, 0), (0, 0)))
    wk = jnp.transpose(weight[..., 0], (2, 3, 1, 0))
    ref = xl
    for ds in range(3):
        for dt in range(3):
            ref = ref + jnp.einsum(
                "bstpc,cd->bstpd",
                x_pad[:, ds:ds + S, dt:dt + T], wk[ds, dt],
                precision=jax.lax.Precision.HIGHEST)
    ref = jnp.transpose(ref, (0, 1, 4, 2, 3)).reshape(b, C, T, H, W)

    assert out.shape == x.shape and out.dtype == x.dtype
    # tolerance sized for bf16 MXU operands over a K = 3*C contraction
    # (plus the identity-folded residual tap in bf16)
    assert jnp.allclose(out, ref, rtol=2e-2, atol=5e-2), "mismatch vs reference"
    print("KERNEL_OK")
</pallas_src>

<mosaic_0001>
module attributes {stable_mosaic.version = 11 : i64} {
  func.func @r4d_kernel(%arg0: i32, %arg1: i32, %arg2: memref<1x768x1024xbf16, #tpu.memory_space<vmem>>, %arg3: memref<3x128x384xbf16, #tpu.memory_space<vmem>>, %arg4: memref<1x1x128x512xf32, #tpu.memory_space<vmem>>) attributes {dimension_semantics = [#tpu.dimension_semantics<parallel>, #tpu.dimension_semantics<arbitrary>], iteration_bounds = array<i64: 2, 4>, scalar_prefetch = 0 : i64, scratch_operands = 0 : i64, tpu.core_type = #tpu.core_type<tc>, window_params = [{transform_indices = @transform_0, window_bounds = array<i64: 1, 768, 1024>}, {pipeline_mode = #tpu.pipeline_mode<synchronous>, transform_indices = @transform_1, window_bounds = array<i64: 3, 128, 384>}, {transform_indices = @transform_2, window_bounds = array<i64: 1, 1, 128, 512>}]} {
    %c128_i32 = arith.constant 128 : i32
    %0 = arith.muli %arg1, %c128_i32 : i32
    %1 = tpu.assume_multiple %0, 16 : i32
    %c0 = arith.constant 0 : index
    %2 = arith.index_cast %1 : i32 to index
    %c0_0 = arith.constant 0 : index
    %3 = vector.load %arg2[%c0, %2, %c0_0] : memref<1x768x1024xbf16, #tpu.memory_space<vmem>>, vector<1x384x512xbf16>
    %4 = vector.shape_cast %3 : vector<1x384x512xbf16> to vector<384x512xbf16>
    %c0_1 = arith.constant 0 : index
    %c0_2 = arith.constant 0 : index
    %c0_3 = arith.constant 0 : index
    %5 = vector.load %arg3[%c0_1, %c0_2, %c0_3] : memref<3x128x384xbf16, #tpu.memory_space<vmem>>, vector<1x128x384xbf16>
    %6 = vector.shape_cast %5 : vector<1x128x384xbf16> to vector<128x384xbf16>
    %cst = arith.constant dense<0.000000e+00> : vector<128x512xf32>
    %7 = tpu.matmul %6, %4, %cst {dimension_numbers = #tpu.dot_dimension_numbers<[1], [0], [0], [1], [0, 0, 1, 1], [], []>} : vector<128x384xbf16>, vector<384x512xbf16>, vector<128x512xf32> -> vector<128x512xf32>
    %c0_4 = arith.constant 0 : index
    %8 = arith.index_cast %1 : i32 to index
    %c256 = arith.constant 256 : index
    %9 = vector.load %arg2[%c0_4, %8, %c256] : memref<1x768x1024xbf16, #tpu.memory_space<vmem>>, vector<1x384x512xbf16>
    %10 = vector.shape_cast %9 : vector<1x384x512xbf16> to vector<384x512xbf16>
    %c1 = arith.constant 1 : index
    %c0_5 = arith.constant 0 : index
    %c0_6 = arith.constant 0 : index
    %11 = vector.load %arg3[%c1, %c0_5, %c0_6] : memref<3x128x384xbf16, #tpu.memory_space<vmem>>, vector<1x128x384xbf16>
    %12 = vector.shape_cast %11 : vector<1x128x384xbf16> to vector<128x384xbf16>
    %cst_7 = arith.constant dense<0.000000e+00> : vector<128x512xf32>
    %13 = tpu.matmul %12, %10, %cst_7 {dimension_numbers = #tpu.dot_dimension_numbers<[1], [0], [0], [1], [0, 0, 1, 1], [], []>} : vector<128x384xbf16>, vector<384x512xbf16>, vector<128x512xf32> -> vector<128x512xf32>
    %14 = arith.addf %7, %13 : vector<128x512xf32>
    %c0_8 = arith.constant 0 : index
    %15 = arith.index_cast %1 : i32 to index
    %c512 = arith.constant 512 : index
    %16 = vector.load %arg2[%c0_8, %15, %c512] : memref<1x768x1024xbf16, #tpu.memory_space<vmem>>, vector<1x384x512xbf16>
    %17 = vector.shape_cast %16 : vector<1x384x512xbf16> to vector<384x512xbf16>
    %c2 = arith.constant 2 : index
    %c0_9 = arith.constant 0 : index
    %c0_10 = arith.constant 0 : index
    %18 = vector.load %arg3[%c2, %c0_9, %c0_10] : memref<3x128x384xbf16, #tpu.memory_space<vmem>>, vector<1x128x384xbf16>
    %19 = vector.shape_cast %18 : vector<1x128x384xbf16> to vector<128x384xbf16>
    %cst_11 = arith.constant dense<0.000000e+00> : vector<128x512xf32>
    %20 = tpu.matmul %19, %17, %cst_11 {dimension_numbers = #tpu.dot_dimension_numbers<[1], [0], [0], [1], [0, 0, 1, 1], [], []>} : vector<128x384xbf16>, vector<384x512xbf16>, vector<128x512xf32> -> vector<128x512xf32>
    %21 = arith.addf %14, %20 : vector<128x512xf32>
    %c0_12 = arith.constant 0 : index
    %c0_13 = arith.constant 0 : index
    %c0_14 = arith.constant 0 : index
    %c0_15 = arith.constant 0 : index
    %22 = vector.load %arg4[%c0_12, %c0_13, %c0_14, %c0_15] : memref<1x1x128x512xf32, #tpu.memory_space<vmem>>, vector<1x1x128x512xf32>
    %23 = vector.shape_cast %22 : vector<1x1x128x512xf32> to vector<128x512xf32>
    %24 = vector.shape_cast %21 : vector<128x512xf32> to vector<1x1x128x512xf32>
    tpu.vector_store %arg4[%c0_12, %c0_13, %c0_14, %c0_15], %24 {strides = array<i32>} : memref<1x1x128x512xf32, #tpu.memory_space<vmem>>, vector<1x1x128x512xf32>,
    return
  }
  func.func @transform_0(%arg0: i32, %arg1: i32) -> (i32, i32, i32) {
    %c0_i32 = arith.constant 0 : i32
    %c0_i32_0 = arith.constant 0 : i32
    %c0_i32_1 = arith.constant 0 : i32
    return %arg0, %c0_i32, %c0_i32_0 : i32, i32, i32
  }
  func.func @transform_1(%arg0: i32, %arg1: i32) -> (i32, i32, i32) {
    %c0_i32 = arith.constant 0 : i32
    %c0_i32_0 = arith.constant 0 : i32
    %c0_i32_1 = arith.constant 0 : i32
    %c0_i32_2 = arith.constant 0 : i32
    return %c0_i32, %c0_i32_0, %c0_i32_1 : i32, i32, i32
  }
  func.func @transform_2(%arg0: i32, %arg1: i32) -> (i32, i32, i32, i32) {
    %c0_i32 = arith.constant 0 : i32
    %c0_i32_0 = arith.constant 0 : i32
    %c0_i32_1 = arith.constant 0 : i32
    return %arg0, %arg1, %c0_i32, %c0_i32_0 : i32, i32, i32, i32
  }
}

</mosaic_0001>

<bundles_post_ra>
// kernel: r4d_forward.1
= control target key start
LH: loop header
LB: loop body
LE: loop exit
PB: predicated region body
PF: predicated region fallthrough
CT: control target
= control target key end

     0   :  { %s4572_s9 = smov 0   ;;  %s4574_s10 = smov 0   ;;  %s5396_s0 = inlined_call_operand.vmem [shape: bf16[2,768,1024], index: 0, kind: input, shape index: {}]   ;;  %s5397_s1 = inlined_call_operand.vmem [shape: bf16[3,128,384], index: 1, kind: input, shape index: {}]   ;;  %s5398_s2 = inlined_call_operand.vmem [shape: f32[2,4,128,512], index: 2, kind: output, shape index: {}]  }
   0x1   :  { %s4576_s11 = smov 0   ;;  %s4578_s12 = smov 0  }
   0x2   :  { %s4580_s13 = smov 0  }
   0x3 LB: > { %s21_s14 = sadd.s32 1, %s4546_s11  ;;  %s24_s15 = sadd.s32 1, %s4550_s12  ;;  %s4554_s13 = sphi %s4580_s13, %s12_s13   ;;  %s4550_s12 = sphi %s4578_s12, %s5402_s12   ;;  %s4546_s11 = sphi %s4576_s11, %s5401_s11   ;;  %s4542_s10 = sphi %s4574_s10, %s5400_s10   ;;  %s4538_s9 = sphi %s4572_s9, %s5399_s9  }
   0x4   : > { %p22_p0 = scmp.ge.s32.totalorder %s21_s14, 4  ;;  %p3671_p1 = scmp.ge.s32.totalorder %s4554_s13, 1 }
   0x5   : > { %p126_p2 = scmp.lt.s32.totalorder %s4554_s13, 9 }
   0x6   : > { %s5404_s14 = smov (%p22_p0, %s21_s14), 0  ;;  %s5406_s15 = smov (!%p22_p0, %s24_s15), %s4550_s12 }
   0x7   : > { %p127_p3 = pnand %p3671_p1, %p126_p2  ;;  %p26_p4 = scmp.ge.s32.totalorder %s5406_s15, 2 }
   0x8   : > { %p152_p5 = scmp.lt.s32.totalorder (!%p127_p3), %s4542_s10, 1  ;;  %s3676_s16 = sshll.u32 (!%p127_p3), %s4538_s9, 7  ;;  %v4422_v0 = vld [vmem:[%s5397_s1 + $0xc4] ss:$12 sps:$4 sm:$0xff] (!%p127_p3)  }
   0x9   : > { %s5408_s15 = smov (%p26_p4, %s5406_s15), 0  ;;  %130 = sbr.rel (%p127_p3) target bundleno = 681 (0x2a9), region = 28 }
   0xa   : > { %s168_s17 = sshra.s32 (!%p127_p3), %s3676_s16, 3  ;;  %1022 = vmatprep.mubr.bf16.mxu0 (!%p127_p3), %v4422_v0  ;;  %1248 = vmatprep.mubr.bf16.mxu1 (!%p127_p3), %v4422_v0  ;;  %p159_p6 = scmp.lt.s32.totalorder (!%p127_p3), %s4538_s9, 3 }
   0xb   : > { %s4057_s21 = sshll.u32 (!%p127_p3), %s168_s17, 5 }
  0x10   : > { %s5410_s10 = smov (!%p152_p5, %s4542_s10), 1  ;;  %s5412_s9 = smov (!%p159_p6, %s4538_s9), 3 }
  0x11   : > { %s4378_s20 = smul.u32 3072, %s5410_s10  ;;  %s3673_s26 = sshll.u32 %s5412_s9, 6 }
  0x12   : > { %s3674_s27 = sshll.u32 %s5410_s10, 8 }
  0x13   : > { %s156_s24 = scalar_lea.vmem %s5396_s0, %s4378_s20  ;;  %s163_s28 = sadd.s32 %s3674_s27, %s3673_s26 }
  0x14   : > { %s4614_s25 = scalar_lea.vmem %s156_s24, %s4057_s21  ;;  %s3675_s29 = sshll.u32 %s163_s28, 3 }
  0x15   : > { %v174_v1 = vld [vmem:[%s4614_s25 + $0x8] sm:$0xff]  ;;  %v301_v3 = vld [vmem:[%s4614_s25 + $0x10] sm:$0xff]  ;;  %s5315_s4 = scalar_lea.vmem %s5398_s2, %s3675_s29 }
  0x16   : > { %v176_v2 = vld [vmem:[%s4614_s25 + $0x28] sm:$0xff]  ;;  %v302_v5 = vld [vmem:[%s4614_s25 + $0x30] sm:$0xff] }
  0x17   : > { %v4619_v4 = vcombine.high %v174_v1, %v176_v2  ;;  %v4622_v6 = vcombine.low %v174_v1, %v176_v2  ;;  %v178_v7 = vld [vmem:[%s4614_s25 + $0x48] sm:$0xff]  ;;  %v3738_v9 = vcombine.high %v301_v3, %v302_v5  ;;  %v3737_v10 = vcombine.low %v301_v3, %v302_v5  ;;  %v303_v12 = vld [vmem:[%s4614_s25 + $0x50] sm:$0xff] }
  0x18   : > { %v180_v8 = vld [vmem:[%s4614_s25 + $0x68] sm:$0xff]  ;;  %v304_v13 = vld [vmem:[%s4614_s25 + $0x70] sm:$0xff] }
  0x19   : > { %v4626_v11 = vcombine.high %v178_v7, %v180_v8  ;;  %v182_v14 = vld [vmem:[%s4614_s25 + $0x88] sm:$0xff]  ;;  %990 = vmatprep.subr.bf16.mxu0 %v4619_v4  ;;  %v3742_v15 = vcombine.high %v303_v12, %v304_v13  ;;  %v305_v17 = vld [vmem:[%s4614_s25 + $0x90] sm:$0xff]  ;;  %1216 = vmatprep.subr.bf16.mxu1 %v3738_v9  ;;  %v4636_v19 = vcombine.low %v178_v7, %v180_v8 }
  0x1a   : > { %v184_v16 = vld [vmem:[%s4614_s25 + $0xa8] sm:$0xff]  ;;  %v306_v18 = vld [vmem:[%s4614_s25 + $0xb0] sm:$0xff]  ;;  %991 = vmatpush1.bf16.msra.mxu0 %v4622_v6  ;;  %1217 = vmatpush1.bf16.msra.mxu1 %v3737_v10  ;;  %v3741_v20 = vcombine.low %v303_v12, %v304_v13 }
  0x1b   : > { %992 = vmatprep.subr.bf16.mxu0 %v4626_v11  ;;  %v4639_v21 = vcombine.high %v182_v14, %v184_v16  ;;  %1218 = vmatprep.subr.bf16.mxu1 %v3742_v15  ;;  %v3746_v22 = vcombine.high %v305_v17, %v306_v18  ;;  %v186_v23 = vld [vmem:[%s4614_s25 + $0xc8] sm:$0xff]  ;;  %v307_v25 = vld [vmem:[%s4614_s25 + $0xd0] sm:$0xff]  ;;  %v4646_v27 = vcombine.low %v182_v14, %v184_v16 }
  0x1c   : > { %v188_v24 = vld [vmem:[%s4614_s25 + $0xe8] sm:$0xff]  ;;  %v308_v26 = vld [vmem:[%s4614_s25 + $0xf0] sm:$0xff]  ;;  %v3745_v28 = vcombine.low %v305_v17, %v306_v18 }
  0x1d   : > { %v4649_v29 = vcombine.high %v186_v23, %v188_v24  ;;  %v3750_v30 = vcombine.high %v307_v25, %v308_v26  ;;  %v190_v31 = vld [vmem:[%s4614_s25 + $0x108] sm:$0xff]  ;;  %v309_v33 = vld [vmem:[%s4614_s25 + $0x110] sm:$0xff]  ;;  %v4656_v35 = vcombine.low %v186_v23, %v188_v24  ;;  %v3749_v36 = vcombine.low %v307_v25, %v308_v26 }
  0x1e   : > { %993 = vmatpush1.bf16.msra.mxu0 %v4636_v19  ;;  %1219 = vmatpush1.bf16.msra.mxu1 %v3741_v20  ;;  %v192_v32 = vld [vmem:[%s4614_s25 + $0x128] sm:$0xff]  ;;  %v310_v34 = vld [vmem:[%s4614_s25 + $0x130] sm:$0xff] }
  0x1f   : > { %994 = vmatprep.subr.bf16.mxu0 %v4639_v21  ;;  %1220 = vmatprep.subr.bf16.mxu1 %v3746_v22  ;;  %v4659_v37 = vcombine.high %v190_v31, %v192_v32  ;;  %v3754_v38 = vcombine.high %v309_v33, %v310_v34  ;;  %v194_v39 = vld [vmem:[%s4614_s25 + $0x148] sm:$0xff]  ;;  %v311_v41 = vld [vmem:[%s4614_s25 + $0x150] sm:$0xff]  ;;  %v4666_v43 = vcombine.low %v190_v31, %v192_v32 }
  0x20   : > { %v196_v40 = vld [vmem:[%s4614_s25 + $0x168] sm:$0xff]  ;;  %v312_v42 = vld [vmem:[%s4614_s25 + $0x170] sm:$0xff]  ;;  %v3753_v44 = vcombine.low %v309_v33, %v310_v34 }
  0x21   : > { %v4669_v45 = vcombine.high %v194_v39, %v196_v40  ;;  %v3758_v46 = vcombine.high %v311_v41, %v312_v42  ;;  %v198_v47 = vld [vmem:[%s4614_s25 + $0x188] sm:$0xff]  ;;  %v313_v49 = vld [vmem:[%s4614_s25 + $0x190] sm:$0xff]  ;;  %v4676_v51 = vcombine.low %v194_v39, %v196_v40  ;;  %v3757_v52 = vcombine.low %v311_v41, %v312_v42 }
  0x22   : > { %995 = vmatpush1.bf16.msra.mxu0 %v4646_v27  ;;  %1221 = vmatpush1.bf16.msra.mxu1 %v3745_v28  ;;  %v200_v48 = vld [vmem:[%s4614_s25 + $0x1a8] sm:$0xff]  ;;  %v314_v50 = vld [vmem:[%s4614_s25 + $0x1b0] sm:$0xff] }
  0x23   : > { %996 = vmatprep.subr.bf16.mxu0 %v4649_v29  ;;  %1222 = vmatprep.subr.bf16.mxu1 %v3750_v30  ;;  %v4679_v53 = vcombine.high %v198_v47, %v200_v48  ;;  %v3762_v54 = vcombine.high %v313_v49, %v314_v50  ;;  %v202_v55 = vld [vmem:[%s4614_s25 + $0x1c8] sm:$0xff]  ;;  %v315_v57 = vld [vmem:[%s4614_s25 + $0x1d0] sm:$0xff]  ;;  %v4686_v59 = vcombine.low %v198_v47, %v200_v48 }
  0x24   : > { %v204_v56 = vld [vmem:[%s4614_s25 + $0x1e8] sm:$0xff]  ;;  %v316_v58 = vld [vmem:[%s4614_s25 + $0x1f0] sm:$0xff]  ;;  %v3761_v60 = vcombine.low %v313_v49, %v314_v50 }
  0x25   : > { %v4689_v61 = vcombine.high %v202_v55, %v204_v56  ;;  %v3766_v62 = vcombine.high %v315_v57, %v316_v58  ;;  %v206_v63 = vld [vmem:[%s4614_s25 + $0x208] sm:$0xff]  ;;  %v317_v1 = vld [vmem:[%s4614_s25 + $0x210] sm:$0xff]  ;;  %v4696_v3 = vcombine.low %v202_v55, %v204_v56  ;;  %v3765_v5 = vcombine.low %v315_v57, %v316_v58 }
  0x26   : > { %997 = vmatpush1.bf16.msra.mxu0 %v4656_v35  ;;  %1223 = vmatpush1.bf16.msra.mxu1 %v3749_v36  ;;  %v208_v0 = vld [vmem:[%s4614_s25 + $0x228] sm:$0xff]  ;;  %v318_v2 = vld [vmem:[%s4614_s25 + $0x230] sm:$0xff] }
  0x27   : > { %998 = vmatprep.subr.bf16.mxu0 %v4659_v37  ;;  %1224 = vmatprep.subr.bf16.mxu1 %v3754_v38  ;;  %v4699_v7 = vcombine.high %v206_v63, %v208_v0  ;;  %v3770_v8 = vcombine.high %v317_v1, %v318_v2  ;;  %v210_v9 = vld [vmem:[%s4614_s25 + $0x248] sm:$0xff]  ;;  %v319_v12 = vld [vmem:[%s4614_s25 + $0x250] sm:$0xff]  ;;  %v4706_v14 = vcombine.low %v206_v63, %v208_v0 }
  0x28   : > { %v212_v10 = vld [vmem:[%s4614_s25 + $0x268] sm:$0xff]  ;;  %v320_v13 = vld [vmem:[%s4614_s25 + $0x270] sm:$0xff]  ;;  %v3769_v15 = vcombine.low %v317_v1, %v318_v2 }
  0x29   : > { %v4709_v16 = vcombine.high %v210_v9, %v212_v10  ;;  %v3774_v17 = vcombine.high %v319_v12, %v320_v13  ;;  %v214_v18 = vld [vmem:[%s4614_s25 + $0x288] sm:$0xff]  ;;  %v321_v22 = vld [vmem:[%s4614_s25 + $0x290] sm:$0xff]  ;;  %v4716_v24 = vcombine.low %v210_v9, %v212_v10  ;;  %v3773_v25 = vcombine.low %v319_v12, %v320_v13 }
  0x2a   : > { %999 = vmatpush1.bf16.msra.mxu0 %v4666_v43  ;;  %1225 = vmatpush1.bf16.msra.mxu1 %v3753_v44  ;;  %v216_v20 = vld [vmem:[%s4614_s25 + $0x2a8] sm:$0xff]  ;;  %v322_v23 = vld [vmem:[%s4614_s25 + $0x2b0] sm:$0xff] }
  0x2b   : > { %1000 = vmatprep.subr.bf16.mxu0 %v4669_v45  ;;  %1226 = vmatprep.subr.bf16.mxu1 %v3758_v46  ;;  %v4719_v26 = vcombine.high %v214_v18, %v216_v20  ;;  %v3778_v28 = vcombine.high %v321_v22, %v322_v23  ;;  %v218_v30 = vld [vmem:[%s4614_s25 + $0x2c8] sm:$0xff]  ;;  %v323_v32 = vld [vmem:[%s4614_s25 + $0x2d0] sm:$0xff]  ;;  %v4726_v34 = vcombine.low %v214_v18, %v216_v20 }
  0x2c   : > { %v220_v31 = vld [vmem:[%s4614_s25 + $0x2e8] sm:$0xff]  ;;  %v324_v33 = vld [vmem:[%s4614_s25 + $0x2f0] sm:$0xff]  ;;  %v3777_v36 = vcombine.low %v321_v22, %v322_v23 }
  0x2d   : > { %v4729_v38 = vcombine.high %v218_v30, %v220_v31  ;;  %v3782_v39 = vcombine.high %v323_v32, %v324_v33  ;;  %v222_v40 = vld [vmem:[%s4614_s25 + $0x308] sm:$0xff]  ;;  %v325_v42 = vld [vmem:[%s4614_s25 + $0x310] sm:$0xff]  ;;  %v4736_v46 = vcombine.low %v218_v30, %v220_v31  ;;  %v3781_v47 = vcombine.low %v323_v32, %v324_v33 }
  0x2e   : > { %1001 = vmatpush1.bf16.msra.mxu0 %v4676_v51  ;;  %1227 = vmatpush1.bf16.msra.mxu1 %v3757_v52  ;;  %v224_v41 = vld [vmem:[%s4614_s25 + $0x328] sm:$0xff]  ;;  %v326_v44 = vld [vmem:[%s4614_s25 + $0x330] sm:$0xff] }
  0x2f   : > { %1002 = vmatprep.subr.bf16.mxu0 %v4679_v53  ;;  %1228 = vmatprep.subr.bf16.mxu1 %v3762_v54  ;;  %v4739_v48 = vcombine.high %v222_v40, %v224_v41  ;;  %v226_v49 = vld [vmem:[%s4614_s25 + $0x348] sm:$0xff]  ;;  %v3786_v50 = vcombine.high %v325_v42, %v326_v44  ;;  %v327_v54 = vld [vmem:[%s4614_s25 + $0x350] sm:$0xff]  ;;  %v4746_v56 = vcombine.low %v222_v40, %v224_v41 }
  0x30   : > { %v228_v52 = vld [vmem:[%s4614_s25 + $0x368] sm:$0xff]  ;;  %v328_v55 = vld [vmem:[%s4614_s25 + $0x370] sm:$0xff]  ;;  %v3785_v58 = vcombine.low %v325_v42, %v326_v44 }
  0x31   : > { %v230_v57 = vld [vmem:[%s4614_s25 + $0x388] sm:$0xff]  ;;  %v329_v63 = vld [vmem:[%s4614_s25 + $0x390] sm:$0xff]  ;;  %v3790_v0 = vcombine.high %v327_v54, %v328_v55  ;;  %v4756_v2 = vcombine.low %v226_v49, %v228_v52  ;;  %v3789_v9 = vcombine.low %v327_v54, %v328_v55 }
  0x32   : > { %1003 = vmatpush1.bf16.msra.mxu0 %v4686_v59  ;;  %1229 = vmatpush1.bf16.msra.mxu1 %v3761_v60  ;;  %v4750_v60 = vcombine.high %v226_v49, %v228_v52  ;;  %v330_v1 = vld [vmem:[%s4614_s25 + $0x3b0] sm:$0xff]  ;;  %v238_v18 = vld [vmem:[%s4614_s25 + $0x408] sm:$0xff] }
  0x33   : > { %1004 = vmatprep.subr.bf16.mxu0 %v4689_v61  ;;  %1230 = vmatprep.subr.bf16.mxu1 %v3766_v62  ;;  %v232_v62 = vld [vmem:[%s4614_s25 + $0x3a8] sm:$0xff]  ;;  %v331_v12 = vld [vmem:[%s4614_s25 + $0x3d0] sm:$0xff]  ;;  %v3793_v20 = vcombine.low %v329_v63, %v330_v1 }
  0x34   : > { %v4761_v10 = vcombine.high %v230_v57, %v232_v62  ;;  %v332_v13 = vld [vmem:[%s4614_s25 + $0x3f0] sm:$0xff]  ;;  %v240_v23 = vld [vmem:[%s4614_s25 + $0x428] sm:$0xff] }
  0x35   : > { %v3798_v30 = vcombine.high %v331_v12, %v332_v13  ;;  %v3797_v32 = vcombine.low %v331_v12, %v332_v13  ;;  %v4420_v33 = vld [vmem:[%s5397_s1 + $0xc0] ss:$12 sps:$4 sm:$0xff]   ;;  %v335_v42 = vld [vmem:[%s4614_s25 + $0x450] sm:$0xff]  ;;  %v4792_v49 = vcombine.low %v238_v18, %v240_v23 }
  0x36   : > { %1005 = vmatpush1.bf16.msra.mxu0 %v4696_v3  ;;  %1231 = vmatpush1.bf16.msra.mxu1 %v3765_v5  ;;  %v234_v5 = vld [vmem:[%s4614_s25 + $0x3c8] sm:$0xff]  ;;  %v336_v44 = vld [vmem:[%s4614_s25 + $0x470] sm:$0xff] }
  0x37   : > { %1006 = vmatprep.subr.bf16.mxu0 %v4699_v7  ;;  %1232 = vmatprep.subr.bf16.mxu1 %v3770_v8  ;;  %v236_v8 = vld [vmem:[%s4614_s25 + $0x3e8] sm:$0xff]  ;;  %v4426_v12 = vld [vmem:[%s5397_s1 + $0xf4] ss:$12 sps:$4 sm:$0xff]  }
  0x38   : > { %v4770_v22 = vcombine.high %v234_v5, %v236_v8  ;;  %v4776_v31 = vcombine.low %v234_v5, %v236_v8  ;;  %v244_v40 = vld [vmem:[%s4614_s25 + $0x468] sm:$0xff] }
  0x39   : > { %v246_v52 = vld [vmem:[%s4614_s25 + $0x488] sm:$0xff] }
  0x3a   : > { %1007 = vmatpush1.bf16.msra.mxu0 %v4706_v14  ;;  %1233 = vmatpush1.bf16.msra.mxu1 %v3769_v15  ;;  %v3794_v15 = vcombine.high %v329_v63, %v330_v1  ;;  %v248_v54 = vld [vmem:[%s4614_s25 + $0x4a8] sm:$0xff]  ;;  %v3805_v1 = vcombine.low %v335_v42, %v336_v44 }
  0x3b   : > { %1008 = vmatprep.subr.bf16.mxu0 %v4709_v16  ;;  %1234 = vmatprep.subr.bf16.mxu1 %v3774_v17  ;;  %v4766_v17 = vcombine.low %v230_v57, %v232_v62  ;;  %v3806_v57 = vcombine.high %v335_v42, %v336_v44  ;;  %v338_v62 = vld [vmem:[%s4614_s25 + $0x4b0] sm:$0xff]  ;;  %v4807_v5 = vcombine.high %v246_v52, %v248_v54  ;;  %v250_v8 = vld [vmem:[%s4614_s25 + $0x4c8] sm:$0xff] }
  0x3c   : > { %v4428_v44 = vld [vmem:[%s5397_s1 + $0xf0] ss:$12 sps:$4 sm:$0xff]  }
  0x3e   : > { %1009 = vmatpush1.bf16.msra.mxu0 %v4716_v24  ;;  %1235 = vmatpush1.bf16.msra.mxu1 %v3773_v25  ;;  %v333_v25 = vld [vmem:[%s4614_s25 + $0x410] sm:$0xff] }
  0x3f   : > { %1010 = vmatprep.subr.bf16.mxu0 %v4719_v26  ;;  %1236 = vmatprep.subr.bf16.mxu1 %v3778_v28  ;;  %v334_v28 = vld [vmem:[%s4614_s25 + $0x430] sm:$0xff] }
  0x40   : > { %v3802_v41 = vcombine.high %v333_v25, %v334_v28 }
  0x42   : > { %1011 = vmatpush1.bf16.msra.mxu0 %v4726_v34  ;;  %1237 = vmatpush1.bf16.msra.mxu1 %v3777_v36  ;;  %v4782_v36 = vcombine.high %v238_v18, %v240_v23  ;;  %v340_v18 = vld [vmem:[%s4614_s25 + $0x4f0] sm:$0xff]  ;;  %v254_v23 = vld [vmem:[%s4614_s25 + $0x508] sm:$0xff] }
  0x43   : > { %1012 = vmatprep.subr.bf16.mxu0 %v4729_v38  ;;  %1238 = vmatprep.subr.bf16.mxu1 %v3782_v39  ;;  %v242_v39 = vld [vmem:[%s4614_s25 + $0x448] sm:$0xff] }
  0x44   : > { %v4797_v55 = vcombine.high %v242_v39, %v244_v40  ;;  %v4802_v63 = vcombine.low %v242_v39, %v244_v40  ;;  %v342_v39 = vld [vmem:[%s4614_s25 + $0x530] sm:$0xff] }
  0x46   : > { %1013 = vmatpush1.bf16.msra.mxu0 %v4736_v46  ;;  %1239 = vmatpush1.bf16.msra.mxu1 %v3781_v47  ;;  %v4423_v47 = vld [vmem:[%s5397_s1 + $0xdc] ss:$12 sps:$4 sm:$0xff]  }
  0x47   : > { %1014 = vmatprep.subr.bf16.mxu0 %v4739_v48  ;;  %1240 = vmatprep.subr.bf16.mxu1 %v3786_v50  ;;  %v3801_v50 = vcombine.low %v333_v25, %v334_v28 }
  0x4a   : > { %1015 = vmatpush1.bf16.msra.mxu0 %v4746_v56  ;;  %1241 = vmatpush1.bf16.msra.mxu1 %v3785_v58  ;;  %v337_v58 = vld [vmem:[%s4614_s25 + $0x490] sm:$0xff] }
  0x4b   : > { %1016 = vmatprep.subr.bf16.mxu0 %v4750_v60  ;;  %1242 = vmatprep.subr.bf16.mxu1 %v3790_v0  ;;  %v4425_v0 = vld [vmem:[%s5397_s1 + $0xd8] ss:$12 sps:$4 sm:$0xff]   ;;  %v3810_v13 = vcombine.high %v337_v58, %v338_v62  ;;  %v3809_v25 = vcombine.low %v337_v58, %v338_v62  ;;  %v344_v58 = vld [vmem:[%s4614_s25 + $0x570] sm:$0xff] }
  0x4e   : > { %1017 = vmatpush1.bf16.msra.mxu0 %v4756_v2  ;;  %1243 = vmatpush1.bf16.msra.mxu1 %v3789_v9  ;;  %v252_v9 = vld [vmem:[%s4614_s25 + $0x4e8] sm:$0xff] }
  0x4f   : > { %1018 = vmatprep.subr.bf16.mxu0 %v4761_v10  ;;  %1244 = vmatprep.subr.bf16.mxu1 %v3794_v15  ;;  %v339_v15 = vld [vmem:[%s4614_s25 + $0x4d0] sm:$0xff]  ;;  %v4822_v28 = vcombine.high %v250_v8, %v252_v9  ;;  %v4828_v40 = vcombine.low %v250_v8, %v252_v9  ;;  %v262_v9 = vld [vmem:[%s4614_s25 + $0x588] sm:$0xff] }
  0x52   : > { %1019 = vmatpush1.bf16.msra.mxu0 %v4766_v17  ;;  %1245 = vmatpush1.bf16.msra.mxu1 %v3793_v20  ;;  %v4818_v20 = vcombine.low %v246_v52, %v248_v54  ;;  %v260_v52 = vld [vmem:[%s4614_s25 + $0x568] sm:$0xff] }
  0x53   : > { %1020 = vmatprep.subr.bf16.mxu0 %v4770_v22  ;;  %1246 = vmatprep.subr.bf16.mxu1 %v3798_v30  ;;  %v3814_v30 = vcombine.high %v339_v15, %v340_v18  ;;  %v4429_v54 = vld [vmem:[%s5397_s1 + $0x10c] ss:$12 sps:$4 sm:$0xff]  }
  0x56   : > { %1021 = vmatpush1.bf16.msra.mxu0 %v4776_v31  ;;  %1247 = vmatpush1.bf16.msra.mxu1 %v3797_v32  ;;  %v256_v32 = vld [vmem:[%s4614_s25 + $0x528] sm:$0xff] }
  0x57   : > { %1103 = vmatprep.subr.bf16.mxu0 %v4782_v36  ;;  %1329 = vmatprep.subr.bf16.mxu1 %v3802_v41  ;;  %v3813_v41 = vcombine.low %v339_v15, %v340_v18  ;;  %v4831_v42 = vcombine.high %v254_v23, %v256_v32  ;;  %v4844_v62 = vcombine.low %v254_v23, %v256_v32  ;;  %v346_v15 = vld [vmem:[%s4614_s25 + $0x5b0] sm:$0xff] }
  0x59   : > { %1023 = vmatmul.mubr.bf16.vlgmr.msra.gmra.mrb[0].mxu0 %v4420_v33  ;;  %1249 = vmatmul.mubr.bf16.vlgmr.msra.gmra.mrb[0].mxu1 %v4420_v33  ;;  %v341_v33 = vld [vmem:[%s4614_s25 + $0x510] sm:$0xff] }
  0x5a   : > { %1104 = vmatpush1.bf16.msra.mxu0 %v4792_v49  ;;  %1330 = vmatpush1.bf16.msra.mxu1 %v3801_v50  ;;  %v258_v50 = vld [vmem:[%s4614_s25 + $0x548] sm:$0xff] }
  0x5b   : > { %1032 = vmatprep.mubr.bf16.mxu0 %v4423_v47  ;;  %1258 = vmatprep.mubr.bf16.mxu1 %v4423_v47  ;;  %v3818_v47 = vcombine.high %v341_v33, %v342_v39  ;;  %v4854_v18 = vcombine.low %v258_v50, %v260_v52 }
  0x5c   : > { %1105 = vmatprep.subr.bf16.mxu0 %v4797_v55  ;;  %1331 = vmatprep.subr.bf16.mxu1 %v3806_v57  ;;  %v343_v57 = vld [vmem:[%s4614_s25 + $0x550] sm:$0xff] }
  0x5d   : > { %v3822_v8 = vcombine.high %v343_v57, %v344_v58  ;;  %v3821_v23 = vcombine.low %v343_v57, %v344_v58  ;;  %v173_v58 = vld [vmem:[%s4614_s25] sm:$0xff] }
  0x5e   : > { %1106 = vmatpush1.bf16.msra.mxu0 %v4802_v63  ;;  %1332 = vmatpush1.bf16.msra.mxu1 %v3805_v1  ;;  %v4847_v1 = vcombine.high %v258_v50, %v260_v52 }
  0x5f   : > { %1107 = vmatprep.subr.bf16.mxu0 %v4807_v5  ;;  %1333 = vmatprep.subr.bf16.mxu1 %v3810_v13  ;;  %v345_v13 = vld [vmem:[%s4614_s25 + $0x590] sm:$0xff] }
  0x60   : > { %v3826_v32 = vcombine.high %v345_v13, %v346_v15  ;;  %v3825_v52 = vcombine.low %v345_v13, %v346_v15  ;;  %v4434_v13 = vld [vmem:[%s5397_s1 + $0x120] ss:$12 sps:$4 sm:$0xff]   ;;  %v4435_v15 = vld [vmem:[%s5397_s1 + $0x13c] ss:$12 sps:$4 sm:$0xff]  }
  0x61   : > { %1033 = vmatmul.mubr.bf16.gmra.mrb[4].mxu0 %v4425_v0  ;;  %1259 = vmatmul.mubr.bf16.gmra.mrb[4].mxu1 %v4425_v0  ;;  %v3817_v0 = vcombine.low %v341_v33, %v342_v39  ;;  %v266_v33 = vld [vmem:[%s4614_s25 + $0x5c8] sm:$0xff] }
  0x62   : > { %1042 = vmatprep.mubr.bf16.mxu0 %v4426_v12  ;;  %1268 = vmatprep.mubr.bf16.mxu1 %v4426_v12  ;;  %v264_v12 = vld [vmem:[%s4614_s25 + $0x5a8] sm:$0xff] }
  0x63   : > { %1108 = vmatpush1.bf16.msra.mxu0 %v4818_v20  ;;  %1334 = vmatpush1.bf16.msra.mxu1 %v3809_v25  ;;  %v4857_v25 = vcombine.high %v262_v9, %v264_v12  ;;  %v268_v39 = vld [vmem:[%s4614_s25 + $0x5e8] sm:$0xff]  ;;  %v4870_v50 = vcombine.low %v262_v9, %v264_v12 }
  0x64   : > { %1109 = vmatprep.subr.bf16.mxu0 %v4822_v28  ;;  %1335 = vmatprep.subr.bf16.mxu1 %v3814_v30  ;;  %v4431_v30 = vld [vmem:[%s5397_s1 + $0x108] ss:$12 sps:$4 sm:$0xff]  }
  0x67   : > { %1110 = vmatpush1.bf16.msra.mxu0 %v4828_v40  ;;  %1336 = vmatpush1.bf16.msra.mxu1 %v3813_v41  ;;  %v4432_v41 = vld [vmem:[%s5397_s1 + $0x124] ss:$12 sps:$4 sm:$0xff]  }
  0x68   : > { %1111 = vmatprep.subr.bf16.mxu0 %v4831_v42  ;;  %1337 = vmatprep.subr.bf16.mxu1 %v3818_v47  ;;  %v348_v47 = vld [vmem:[%s4614_s25 + $0x5f0] sm:$0xff] }
  0x69   : > { %1043 = vmatmul.mubr.bf16.gmra.mrb[8].mxu0 %v4428_v44  ;;  %1269 = vmatmul.mubr.bf16.gmra.mrb[8].mxu1 %v4428_v44  ;;  %v347_v44 = vld [vmem:[%s4614_s25 + $0x5d0] sm:$0xff] }
  0x6a   : > { %1052 = vmatprep.mubr.bf16.mxu0 %v4429_v54  ;;  %1278 = vmatprep.mubr.bf16.mxu1 %v4429_v54  ;;  %v4873_v54 = vcombine.high %v266_v33, %v268_v39  ;;  %v3830_v57 = vcombine.high %v347_v44, %v348_v47  ;;  %v3829_v9 = vcombine.low %v347_v44, %v348_v47  ;;  %v179_v44 = vld [vmem:[%s4614_s25 + $0x60] sm:$0xff]  ;;  %v4444_v47 = vld [vmem:[%s5397_s1 + $0xc8] ss:$12 sps:$4 sm:$0xff]  }
  0x6b   : > { %1112 = vmatpush1.bf16.msra.mxu0 %v4844_v62  ;;  %1338 = vmatpush1.bf16.msra.mxu1 %v3817_v0  ;;  %v175_v0 = vld [vmem:[%s4614_s25 + $0x20] sm:$0xff] }
  0x6c   : > { %1113 = vmatprep.subr.bf16.mxu0 %v4847_v1  ;;  %1339 = vmatprep.subr.bf16.mxu1 %v3822_v8  ;;  %v4878_v8 = vcombine.low %v266_v33, %v268_v39  ;;  %v3856_v12 = vcombine.high %v173_v58, %v175_v0  ;;  %v4443_v33 = vld [vmem:[%s5397_s1 + $0x168] ss:$12 sps:$4 sm:$0xff]   ;;  %v4556_v39 = vmov 0  }
  0x6f   : > { %1114 = vmatpush1.bf16.msra.mxu0 %v4854_v18  ;;  %1340 = vmatpush1.bf16.msra.mxu1 %v3821_v23  ;;  %v4437_v23 = vld [vmem:[%s5397_s1 + $0x138] ss:$12 sps:$4 sm:$0xff]  }
  0x70   : > { %1115 = vmatprep.subr.bf16.mxu0 %v4857_v25  ;;  %1341 = vmatprep.subr.bf16.mxu1 %v3826_v32  ;;  %v4441_v32 = vld [vmem:[%s5397_s1 + $0x16c] ss:$12 sps:$4 sm:$0xff]  }
  0x71   : > { %1053 = vmatmul.mubr.bf16.gmra.mrb[12].mxu0 %v4431_v30  ;;  %1279 = vmatmul.mubr.bf16.gmra.mrb[12].mxu1 %v4431_v30  ;;  %v4438_v30 = vld [vmem:[%s5397_s1 + $0x154] ss:$12 sps:$4 sm:$0xff]  }
  0x72   : > { %1062 = vmatprep.mubr.bf16.mxu0 %v4432_v41  ;;  %1288 = vmatprep.mubr.bf16.mxu1 %v4432_v41  ;;  %v177_v41 = vld [vmem:[%s4614_s25 + $0x40] sm:$0xff] }
  0x73   : > { %1116 = vmatpush1.bf16.msra.mxu0 %v4870_v50  ;;  %1342 = vmatpush1.bf16.msra.mxu1 %v3825_v52  ;;  %v3855_v52 = vcombine.low %v173_v58, %v175_v0  ;;  %v4445_v58 = vld [vmem:[%s5397_s1 + $0xe0] ss:$12 sps:$4 sm:$0xff]  }
  0x74   : > { %1117 = vmatprep.subr.bf16.mxu0 %v4873_v54  ;;  %1343 = vmatprep.subr.bf16.mxu1 %v3830_v57  ;;  %v3858_v57 = vcombine.high %v177_v41, %v179_v44 }
  0x77   : > { %1118 = vmatpush1.bf16.msra.mxu0 %v4878_v8  ;;  %1344 = vmatpush1.bf16.msra.mxu1 %v3829_v9  ;;  %v181_v9 = vld [vmem:[%s4614_s25 + $0x80] sm:$0xff] }
  0x78   : > { %1810 = vmatprep.subr.bf16.mxu0 %v3856_v12  ;;  %2036 = vmatprep.subr.bf16.mxu1 %v4619_v4  ;;  %v4440_v4 = vld [vmem:[%s5397_s1 + $0x150] ss:$12 sps:$4 sm:$0xff]   ;;  %v183_v12 = vld [vmem:[%s4614_s25 + $0xa0] sm:$0xff] }
  0x79   : > { %1063 = vmatmul.mubr.bf16.gmra.mrb[16].mxu0 %v4434_v13  ;;  %1289 = vmatmul.mubr.bf16.gmra.mrb[16].mxu1 %v4434_v13  ;;  %v3857_v13 = vcombine.low %v177_v41, %v179_v44  ;;  %v3859_v0 = vcombine.low %v181_v9, %v183_v12  ;;  %v195_v41 = vld [vmem:[%s4614_s25 + $0x160] sm:$0xff] }
  0x7a   : > { %1072 = vmatprep.mubr.bf16.mxu0 %v4435_v15  ;;  %1298 = vmatprep.mubr.bf16.mxu1 %v4435_v15  ;;  %v3860_v15 = vcombine.high %v181_v9, %v183_v12  ;;  %v203_v9 = vld [vmem:[%s4614_s25 + $0x1e0] sm:$0xff] }
  0x81   : > { %1073 = vmatmul.mubr.bf16.gmra.mrb[20].mxu0 %v4437_v23  ;;  %1299 = vmatmul.mubr.bf16.gmra.mrb[20].mxu1 %v4437_v23  ;;  %v185_v23 = vld [vmem:[%s4614_s25 + $0xc0] sm:$0xff] }
  0x82   : > { %1082 = vmatprep.mubr.bf16.mxu0 %v4438_v30  ;;  %1308 = vmatprep.mubr.bf16.mxu1 %v4438_v30  ;;  %v187_v30 = vld [vmem:[%s4614_s25 + $0xe0] sm:$0xff] }
  0x89   : > { %1083 = vmatmul.mubr.bf16.gmra.mrb[24].mxu0 %v4440_v4  ;;  %1309 = vmatmul.mubr.bf16.gmra.mrb[24].mxu1 %v4440_v4  ;;  %v191_v4 = vld [vmem:[%s4614_s25 + $0x120] sm:$0xff] }
  0x8a   : > { %1092 = vmatprep.mubr.bf16.mxu0 %v4441_v32  ;;  %1318 = vmatprep.mubr.bf16.mxu1 %v4441_v32  ;;  %v3861_v32 = vcombine.low %v185_v23, %v187_v30 }
  0x91   : > { %1093 = vmatmul.mubr.bf16.gmra.mrb[28].mxu0 %v4443_v33  ;;  %1319 = vmatmul.mubr.bf16.gmra.mrb[28].mxu1 %v4443_v33 }
  0x92   : > { %1135 = vmatprep.mubr.bf16.mxu0 %v4556_v39  ;;  %1361 = vmatprep.mubr.bf16.mxu1 %v4556_v39 }
  0x99   : > { %1136 = vmatmul.mubr.bf16.vlgmr.msra.gmra.mrb[0].mxu0 %v4444_v47  ;;  %1362 = vmatmul.mubr.bf16.vlgmr.msra.gmra.mrb[0].mxu1 %v4444_v47  ;;  %v199_v47 = vld [vmem:[%s4614_s25 + $0x1a0] sm:$0xff] }
  0x9a   : > { %1811 = vmatpush1.bf16.msra.mxu0 %v3855_v52  ;;  %2037 = vmatpush1.bf16.msra.mxu1 %v4622_v6  ;;  %v3862_v6 = vcombine.high %v185_v23, %v187_v30  ;;  %v211_v30 = vld [vmem:[%s4614_s25 + $0x260] sm:$0xff] }
  0x9b   : > { %1812 = vmatprep.subr.bf16.mxu0 %v3858_v57  ;;  %2038 = vmatprep.subr.bf16.mxu1 %v4626_v11  ;;  %v189_v11 = vld [vmem:[%s4614_s25 + $0x100] sm:$0xff] }
  0x9c   : > { %1145 = vmatprep.mubr.bf16.mxu0 %v4556_v39  ;;  %1371 = vmatprep.mubr.bf16.mxu1 %v4556_v39  ;;  %v3864_v33 = vcombine.high %v189_v11, %v191_v4  ;;  %v3863_v44 = vcombine.low %v189_v11, %v191_v4  ;;  %v219_v4 = vld [vmem:[%s4614_s25 + $0x2e0] sm:$0xff] }
  0x9e   : > { %1813 = vmatpush1.bf16.msra.mxu0 %v3857_v13  ;;  %2039 = vmatpush1.bf16.msra.mxu1 %v4636_v19  ;;  %v193_v19 = vld [vmem:[%s4614_s25 + $0x140] sm:$0xff] }
  0x9f   : > { %1814 = vmatprep.subr.bf16.mxu0 %v3860_v15  ;;  %2040 = vmatprep.subr.bf16.mxu1 %v4639_v21  ;;  %v4446_v21 = vld [vmem:[%s5397_s1 + $0xf8] ss:$12 sps:$4 sm:$0xff]   ;;  %v3865_v52 = vcombine.low %v193_v19, %v195_v41 }
  0xa0   : > { %v207_v13 = vld [vmem:[%s4614_s25 + $0x220] sm:$0xff] }
  0xa1   : > { %1146 = vmatmul.mubr.bf16.gmra.mrb[4].mxu0 %v4445_v58  ;;  %1372 = vmatmul.mubr.bf16.gmra.mrb[4].mxu1 %v4445_v58 }
  0xa2   : > { %1815 = vmatpush1.bf16.msra.mxu0 %v3859_v0  ;;  %2041 = vmatpush1.bf16.msra.mxu1 %v4646_v27  ;;  %v3866_v27 = vcombine.high %v193_v19, %v195_v41  ;;  %v215_v0 = vld [vmem:[%s4614_s25 + $0x2a0] sm:$0xff] }
  0xa3   : > { %1816 = vmatprep.subr.bf16.mxu0 %v3862_v6  ;;  %2042 = vmatprep.subr.bf16.mxu1 %v4649_v29  ;;  %v197_v29 = vld [vmem:[%s4614_s25 + $0x180] sm:$0xff] }
  0xa4   : > { %1155 = vmatprep.mubr.bf16.mxu0 %v4556_v39  ;;  %1381 = vmatprep.mubr.bf16.mxu1 %v4556_v39  ;;  %v3868_v57 = vcombine.high %v197_v29, %v199_v47  ;;  %v3867_v12 = vcombine.low %v197_v29, %v199_v47 }
  0xa6   : > { %1817 = vmatpush1.bf16.msra.mxu0 %v3861_v32  ;;  %2043 = vmatpush1.bf16.msra.mxu1 %v4656_v35  ;;  %v201_v35 = vld [vmem:[%s4614_s25 + $0x1c0] sm:$0xff] }
  0xa7   : > { %1818 = vmatprep.subr.bf16.mxu0 %v3864_v33  ;;  %2044 = vmatprep.subr.bf16.mxu1 %v4659_v37  ;;  %v4447_v37 = vld [vmem:[%s5397_s1 + $0x110] ss:$12 sps:$4 sm:$0xff]   ;;  %v3869_v15 = vcombine.low %v201_v35, %v203_v9  ;;  %v223_v33 = vld [vmem:[%s4614_s25 + $0x320] sm:$0xff] }
  0xa9   : > { %1156 = vmatmul.mubr.bf16.gmra.mrb[8].mxu0 %v4446_v21  ;;  %1382 = vmatmul.mubr.bf16.gmra.mrb[8].mxu1 %v4446_v21  ;;  %v227_v21 = vld [vmem:[%s4614_s25 + $0x360] sm:$0xff] }
  0xaa   : > { %1819 = vmatpush1.bf16.msra.mxu0 %v3863_v44  ;;  %2045 = vmatpush1.bf16.msra.mxu1 %v4666_v43  ;;  %v3870_v43 = vcombine.high %v201_v35, %v203_v9  ;;  %v237_v35 = vld [vmem:[%s4614_s25 + $0x400] sm:$0xff] }
  0xab   : > { %1820 = vmatprep.subr.bf16.mxu0 %v3866_v27  ;;  %2046 = vmatprep.subr.bf16.mxu1 %v4669_v45  ;;  %v205_v45 = vld [vmem:[%s4614_s25 + $0x200] sm:$0xff] }
  0xac   : > { %1165 = vmatprep.mubr.bf16.mxu0 %v4556_v39  ;;  %1391 = vmatprep.mubr.bf16.mxu1 %v4556_v39  ;;  %v3872_v23 = vcombine.high %v205_v45, %v207_v13  ;;  %v3871_v58 = vcombine.low %v205_v45, %v207_v13  ;;  %v231_v27 = vld [vmem:[%s4614_s25 + $0x3a0] sm:$0xff] }
  0xad   : > { %v239_v9 = vld [vmem:[%s4614_s25 + $0x420] sm:$0xff] }
  0xae   : > { %1821 = vmatpush1.bf16.msra.mxu0 %v3865_v52  ;;  %2047 = vmatpush1.bf16.msra.mxu1 %v4676_v51  ;;  %v209_v51 = vld [vmem:[%s4614_s25 + $0x240] sm:$0xff]  ;;  %v3887_v45 = vcombine.low %v237_v35, %v239_v9 }
  0xaf   : > { %1822 = vmatprep.subr.bf16.mxu0 %v3868_v57  ;;  %2048 = vmatprep.subr.bf16.mxu1 %v4679_v53  ;;  %v4448_v53 = vld [vmem:[%s5397_s1 + $0x128] ss:$12 sps:$4 sm:$0xff]   ;;  %v3873_v6 = vcombine.low %v209_v51, %v211_v30  ;;  %v235_v52 = vld [vmem:[%s4614_s25 + $0x3e0] sm:$0xff] }
  0xb0   : > { %v245_v13 = vld [vmem:[%s4614_s25 + $0x480] sm:$0xff] }
  0xb1   : > { %1166 = vmatmul.mubr.bf16.gmra.mrb[12].mxu0 %v4447_v37  ;;  %1392 = vmatmul.mubr.bf16.gmra.mrb[12].mxu1 %v4447_v37 }
  0xb2   : > { %1823 = vmatpush1.bf16.msra.mxu0 %v3867_v12  ;;  %2049 = vmatpush1.bf16.msra.mxu1 %v4686_v59  ;;  %v3874_v59 = vcombine.high %v209_v51, %v211_v30  ;;  %v241_v12 = vld [vmem:[%s4614_s25 + $0x440] sm:$0xff] }
  0xb3   : > { %1824 = vmatprep.subr.bf16.mxu0 %v3870_v43  ;;  %2050 = vmatprep.subr.bf16.mxu1 %v4689_v61  ;;  %v213_v61 = vld [vmem:[%s4614_s25 + $0x280] sm:$0xff] }
  0xb4   : > { %1175 = vmatprep.mubr.bf16.mxu0 %v4556_v39  ;;  %1401 = vmatprep.mubr.bf16.mxu1 %v4556_v39  ;;  %v3876_v11 = vcombine.high %v213_v61, %v215_v0  ;;  %v3875_v32 = vcombine.low %v213_v61, %v215_v0  ;;  %v243_v43 = vld [vmem:[%s4614_s25 + $0x460] sm:$0xff] }
  0xb5   : > { %v249_v51 = vld [vmem:[%s4614_s25 + $0x4c0] sm:$0xff] }
  0xb6   : > { %1825 = vmatpush1.bf16.msra.mxu0 %v3869_v15  ;;  %2051 = vmatpush1.bf16.msra.mxu1 %v4696_v3  ;;  %v217_v3 = vld [vmem:[%s4614_s25 + $0x2c0] sm:$0xff] }
  0xb7   : > { %1826 = vmatprep.subr.bf16.mxu0 %v3872_v23  ;;  %2052 = vmatprep.subr.bf16.mxu1 %v4699_v7  ;;  %v4449_v7 = vld [vmem:[%s5397_s1 + $0x140] ss:$12 sps:$4 sm:$0xff]   ;;  %v3877_v19 = vcombine.low %v217_v3, %v219_v4  ;;  %v3889_v23 = vcombine.low %v241_v12, %v243_v43 }
  0xb8   : > { %v247_v15 = vld [vmem:[%s4614_s25 + $0x4a0] sm:$0xff] }
  0xb9   : > { %1176 = vmatmul.mubr.bf16.gmra.mrb[16].mxu0 %v4448_v53  ;;  %1402 = vmatmul.mubr.bf16.gmra.mrb[16].mxu1 %v4448_v53  ;;  %v251_v30 = vld [vmem:[%s4614_s25 + $0x4e0] sm:$0xff] }
  0xba   : > { %1827 = vmatpush1.bf16.msra.mxu0 %v3871_v58  ;;  %2053 = vmatpush1.bf16.msra.mxu1 %v4706_v14  ;;  %v3878_v14 = vcombine.high %v217_v3, %v219_v4  ;;  %v4458_v53 = vld [vmem:[%s5397_s1 + $0x34] ss:$12 sps:$4 sm:$0xff]   ;;  %v3894_v58 = vcombine.high %v249_v51, %v251_v30 }
  0xbb   : > { %1828 = vmatprep.subr.bf16.mxu0 %v3874_v59  ;;  %2054 = vmatprep.subr.bf16.mxu1 %v4709_v16  ;;  %v221_v16 = vld [vmem:[%s4614_s25 + $0x300] sm:$0xff] }
  0xbc   : > { %1185 = vmatprep.mubr.bf16.mxu0 %v4556_v39  ;;  %1411 = vmatprep.mubr.bf16.mxu1 %v4556_v39  ;;  %v3880_v41 = vcombine.high %v221_v16, %v223_v33  ;;  %v3879_v44 = vcombine.low %v221_v16, %v223_v33  ;;  %v253_v59 = vld [vmem:[%s4614_s25 + $0x500] sm:$0xff] }
  0xbd   : > { %v255_v61 = vld [vmem:[%s4614_s25 + $0x520] sm:$0xff] }
  0xbe   : > { %1829 = vmatpush1.bf16.msra.mxu0 %v3873_v6  ;;  %2055 = vmatpush1.bf16.msra.mxu1 %v4716_v24  ;;  %v225_v24 = vld [vmem:[%s4614_s25 + $0x340] sm:$0xff]  ;;  %v3895_v3 = vcombine.low %v253_v59, %v255_v61 }
  0xbf   : > { %1830 = vmatprep.subr.bf16.mxu0 %v3876_v11  ;;  %2056 = vmatprep.subr.bf16.mxu1 %v4719_v26  ;;  %v4450_v26 = vld [vmem:[%s5397_s1 + $0x158] ss:$12 sps:$4 sm:$0xff]   ;;  %v3881_v29 = vcombine.low %v225_v24, %v227_v21 }
  0xc0   : > { %v257_v0 = vld [vmem:[%s4614_s25 + $0x540] sm:$0xff]  ;;  %v4461_v11 = vld [vmem:[%s5397_s1 + $0x4c] ss:$12 sps:$4 sm:$0xff]  }
  0xc1   : > { %1186 = vmatmul.mubr.bf16.gmra.mrb[20].mxu0 %v4449_v7  ;;  %1412 = vmatmul.mubr.bf16.gmra.mrb[20].mxu1 %v4449_v7  ;;  %v259_v6 = vld [vmem:[%s4614_s25 + $0x560] sm:$0xff] }
  0xc2   : > { %1831 = vmatpush1.bf16.msra.mxu0 %v3875_v32  ;;  %2057 = vmatpush1.bf16.msra.mxu1 %v4726_v34  ;;  %v3882_v34 = vcombine.high %v225_v24, %v227_v21  ;;  %v261_v4 = vld [vmem:[%s4614_s25 + $0x580] sm:$0xff]  ;;  %v4463_v32 = vld [vmem:[%s5397_s1 + $0x48] ss:$12 sps:$4 sm:$0xff]   ;;  %v2265_v24 = vld [vmem:[%s4614_s25 + $0x38] sm:$0xff] }
  0xc3   : > { %1832 = vmatprep.subr.bf16.mxu0 %v3878_v14  ;;  %2058 = vmatprep.subr.bf16.mxu1 %v4729_v38  ;;  %v229_v38 = vld [vmem:[%s4614_s25 + $0x380] sm:$0xff] }
  0xc4   : > { %1195 = vmatprep.mubr.bf16.mxu0 %v4556_v39  ;;  %1421 = vmatprep.mubr.bf16.mxu1 %v4556_v39  ;;  %v3884_v47 = vcombine.high %v229_v38, %v231_v27  ;;  %v3883_v57 = vcombine.low %v229_v38, %v231_v27  ;;  %v263_v7 = vld [vmem:[%s4614_s25 + $0x5a0] sm:$0xff]  ;;  %v4475_v38 = vld [vmem:[%s5397_s1 + $0xa8] ss:$12 sps:$4 sm:$0xff]  }
  0xc5   : > { %v267_v14 = vld [vmem:[%s4614_s25 + $0x5e0] sm:$0xff]  ;;  %v3899_v33 = vcombine.low %v261_v4, %v263_v7  ;;  %v2266_v27 = vld [vmem:[%s4614_s25 + $0x50] sm:$0xff] }
  0xc6   : > { %1833 = vmatpush1.bf16.msra.mxu0 %v3877_v19  ;;  %2059 = vmatpush1.bf16.msra.mxu1 %v4736_v46  ;;  %v233_v46 = vld [vmem:[%s4614_s25 + $0x3c0] sm:$0xff]  ;;  %v2262_v19 = vld [vmem:[%s4614_s25 + $0x10] sm:$0xff] }
  0xc7   : > { %1834 = vmatprep.subr.bf16.mxu0 %v3880_v41  ;;  %2060 = vmatprep.subr.bf16.mxu1 %v4739_v48  ;;  %v4451_v48 = vld [vmem:[%s5397_s1 + $0x170] ss:$12 sps:$4 sm:$0xff]   ;;  %v3885_v37 = vcombine.low %v233_v46, %v235_v52 }
  0xc8   : > { %v4464_v16 = vld [vmem:[%s5397_s1 + $0x64] ss:$12 sps:$4 sm:$0xff]  }
  0xc9   : > { %1196 = vmatmul.mubr.bf16.gmra.mrb[24].mxu0 %v4450_v26  ;;  %1422 = vmatmul.mubr.bf16.gmra.mrb[24].mxu1 %v4450_v26  ;;  %v2264_v41 = vld [vmem:[%s4614_s25 + $0x30] sm:$0xff] }
  0xca   : > { %1835 = vmatpush1.bf16.msra.mxu0 %v3879_v44  ;;  %2061 = vmatpush1.bf16.msra.mxu1 %v4746_v56  ;;  %v3886_v56 = vcombine.high %v233_v46, %v235_v52  ;;  %v3960_v26 = vcombine.high %v2262_v19, %v2264_v41  ;;  %v4467_v44 = vld [vmem:[%s5397_s1 + $0x7c] ss:$12 sps:$4 sm:$0xff]  }
  0xcb   : > { %1836 = vmatprep.subr.bf16.mxu0 %v3882_v34  ;;  %2062 = vmatprep.subr.bf16.mxu1 %v4750_v60  ;;  %v4454_v60 = vld [vmem:[%s5397_s1 + $0x4] ss:$12 sps:$4 sm:$0xff]   ;;  %v4473_v34 = vld [vmem:[%s5397_s1 + $0xac] ss:$12 sps:$4 sm:$0xff]  }
  0xcc   : > { %1205 = vmatprep.mubr.bf16.mxu0 %v4556_v39  ;;  %1431 = vmatprep.mubr.bf16.mxu1 %v4556_v39  ;;  %v2267_v46 = vld [vmem:[%s4614_s25 + $0x58] sm:$0xff] }
  0xcd   : > { %v2269_v52 = vld [vmem:[%s4614_s25 + $0x78] sm:$0xff] }
  0xce   : > { %1837 = vmatpush1.bf16.msra.mxu0 %v3881_v29  ;;  %2063 = vmatpush1.bf16.msra.mxu1 %v4756_v2  ;;  %v3888_v2 = vcombine.high %v237_v35, %v239_v9  ;;  %v2268_v29 = vld [vmem:[%s4614_s25 + $0x70] sm:$0xff] }
  0xcf   : > { %1838 = vmatprep.subr.bf16.mxu0 %v3884_v47  ;;  %2064 = vmatprep.subr.bf16.mxu1 %v4761_v10  ;;  %v4452_v10 = vld [vmem:[%s5397_s1] ss:$12 sps:$4 sm:$0xff]   ;;  %v4476_v47 = vld [vmem:[%s5397_s1 + $0x8] ss:$12 sps:$4 sm:$0xff]  }
  0xd0   : > { %v2270_v35 = vld [vmem:[%s4614_s25 + $0x90] sm:$0xff] }
  0xd1   : > { %1206 = vmatmul.mubr.bf16.gmra.mrb[28].mxu0 %v4451_v48  ;;  %1432 = vmatmul.mubr.bf16.gmra.mrb[28].mxu1 %v4451_v48  ;;  %v3959_v48 = vcombine.low %v2262_v19, %v2264_v41  ;;  %v2272_v9 = vld [vmem:[%s4614_s25 + $0xb0] sm:$0xff] }
  0xd2   : > { %1839 = vmatpush1.bf16.msra.mxu0 %v3883_v57  ;;  %2065 = vmatpush1.bf16.msra.mxu1 %v4766_v17  ;;  %v4455_v17 = vld [vmem:[%s5397_s1 + $0x1c] ss:$12 sps:$4 sm:$0xff]  }
  0xd3   : > { %1840 = vmatprep.subr.bf16.mxu0 %v3886_v56  ;;  %2066 = vmatprep.subr.bf16.mxu1 %v4770_v22  ;;  %v3890_v22 = vcombine.high %v241_v12, %v243_v43  ;;  %v3964_v56 = vcombine.high %v2266_v27, %v2268_v29  ;;  %v3965_v12 = vcombine.low %v2267_v46, %v2269_v52 }
  0xd4   : > { %1842 = vmatprep.mubr.bf16.mxu0 %v4454_v60  ;;  %2068 = vmatprep.mubr.bf16.mxu1 %v4454_v60  ;;  %v3966_v60 = vcombine.high %v2267_v46, %v2269_v52  ;;  %v3968_v43 = vcombine.high %v2270_v35, %v2272_v9 }
  0xd6   : > { %1841 = vmatpush1.bf16.msra.mxu0 %v3885_v37  ;;  %2067 = vmatpush1.bf16.msra.mxu1 %v4776_v31  ;;  %v3892_v31 = vcombine.high %v245_v13, %v247_v15  ;;  %v2271_v37 = vld [vmem:[%s4614_s25 + $0x98] sm:$0xff] }
  0xd7   : > { %1923 = vmatprep.subr.bf16.mxu0 %v3888_v2  ;;  %2149 = vmatprep.subr.bf16.mxu1 %v4782_v36  ;;  %v4457_v36 = vld [vmem:[%s5397_s1 + $0x18] ss:$12 sps:$4 sm:$0xff]  }
  0xd8   : > { %v2273_v2 = vld [vmem:[%s4614_s25 + $0xb8] sm:$0xff] }
  0xd9   : > { %1843 = vmatmul.mubr.bf16.vlgmr.msra.gmra.mrb[0].mxu0 %v4452_v10  ;;  %2069 = vmatmul.mubr.bf16.vlgmr.msra.gmra.mrb[0].mxu1 %v4452_v10  ;;  %v3963_v10 = vcombine.low %v2266_v27, %v2268_v29  ;;  %v2297_v27 = vld [vmem:[%s4614_s25 + $0x238] sm:$0xff] }
  0xda   : > { %1924 = vmatpush1.bf16.msra.mxu0 %v3887_v45  ;;  %2150 = vmatpush1.bf16.msra.mxu1 %v4792_v49  ;;  %v3891_v49 = vcombine.low %v245_v13, %v247_v15  ;;  %v3970_v45 = vcombine.high %v2271_v37, %v2273_v2  ;;  %v4477_v13 = vld [vmem:[%s5397_s1 + $0x20] ss:$12 sps:$4 sm:$0xff]   ;;  %v2275_v15 = vld [vmem:[%s4614_s25 + $0xd8] sm:$0xff] }
  0xdb   : > { %1852 = vmatprep.mubr.bf16.mxu0 %v4455_v17  ;;  %2078 = vmatprep.mubr.bf16.mxu1 %v4455_v17  ;;  %v2274_v17 = vld [vmem:[%s4614_s25 + $0xd0] sm:$0xff] }
  0xdc   : > { %1925 = vmatprep.subr.bf16.mxu0 %v3890_v22  ;;  %2151 = vmatprep.subr.bf16.mxu1 %v4797_v55  ;;  %v3893_v55 = vcombine.low %v249_v51, %v251_v30  ;;  %v2276_v22 = vld [vmem:[%s4614_s25 + $0xf0] sm:$0xff] }
  0xdd   : > { %v3972_v51 = vcombine.high %v2274_v17, %v2276_v22 }
  0xde   : > { %1926 = vmatpush1.bf16.msra.mxu0 %v3889_v23  ;;  %2152 = vmatpush1.bf16.msra.mxu1 %v4802_v63  ;;  %v3896_v63 = vcombine.high %v253_v59, %v255_v61  ;;  %v2277_v23 = vld [vmem:[%s4614_s25 + $0xf8] sm:$0xff]  ;;  %v3971_v61 = vcombine.low %v2274_v17, %v2276_v22 }
  0xdf   : > { %1927 = vmatprep.subr.bf16.mxu0 %v3892_v31  ;;  %2153 = vmatprep.subr.bf16.mxu1 %v4807_v5  ;;  %v4460_v5 = vld [vmem:[%s5397_s1 + $0x30] ss:$12 sps:$4 sm:$0xff]   ;;  %v3967_v31 = vcombine.low %v2270_v35, %v2272_v9  ;;  %v3974_v30 = vcombine.high %v2275_v15, %v2277_v23 }
  0xe0   : > { %v2281_v59 = vld [vmem:[%s4614_s25 + $0x138] sm:$0xff] }
  0xe1   : > { %1853 = vmatmul.mubr.bf16.gmra.mrb[4].mxu0 %v4457_v36  ;;  %2079 = vmatmul.mubr.bf16.gmra.mrb[4].mxu1 %v4457_v36  ;;  %v3969_v36 = vcombine.low %v2271_v37, %v2273_v2  ;;  %v2301_v35 = vld [vmem:[%s4614_s25 + $0x278] sm:$0xff] }
  0xe2   : > { %1862 = vmatprep.mubr.bf16.mxu0 %v4458_v53  ;;  %2088 = vmatprep.mubr.bf16.mxu1 %v4458_v53  ;;  %v2278_v53 = vld [vmem:[%s4614_s25 + $0x110] sm:$0xff]  ;;  %v2305_v17 = vld [vmem:[%s4614_s25 + $0x2b8] sm:$0xff] }
  0xe3   : > { %1928 = vmatpush1.bf16.msra.mxu0 %v3891_v49  ;;  %2154 = vmatpush1.bf16.msra.mxu1 %v4818_v20  ;;  %v3898_v20 = vcombine.high %v257_v0, %v259_v6  ;;  %v2280_v49 = vld [vmem:[%s4614_s25 + $0x130] sm:$0xff] }
  0xe4   : > { %1929 = vmatprep.subr.bf16.mxu0 %v3894_v58  ;;  %2155 = vmatprep.subr.bf16.mxu1 %v4822_v28  ;;  %v3897_v28 = vcombine.low %v257_v0, %v259_v6  ;;  %v2279_v58 = vld [vmem:[%s4614_s25 + $0x118] sm:$0xff]  ;;  %v2282_v0 = vld [vmem:[%s4614_s25 + $0x150] sm:$0xff] }
  0xe5   : > { %v2284_v6 = vld [vmem:[%s4614_s25 + $0x170] sm:$0xff] }
  0xe7   : > { %1930 = vmatpush1.bf16.msra.mxu0 %v3893_v55  ;;  %2156 = vmatpush1.bf16.msra.mxu1 %v4828_v40  ;;  %v3900_v40 = vcombine.high %v261_v4, %v263_v7  ;;  %v3973_v55 = vcombine.low %v2275_v15, %v2277_v23  ;;  %v3975_v4 = vcombine.low %v2278_v53, %v2280_v49 }
  0xe8   : > { %1931 = vmatprep.subr.bf16.mxu0 %v3896_v63  ;;  %2157 = vmatprep.subr.bf16.mxu1 %v4831_v42  ;;  %v265_v42 = vld [vmem:[%s4614_s25 + $0x5c0] sm:$0xff]  ;;  %v3976_v63 = vcombine.high %v2278_v53, %v2280_v49  ;;  %v3977_v7 = vcombine.low %v2279_v58, %v2281_v59  ;;  %v2309_v53 = vld [vmem:[%s4614_s25 + $0x2f8] sm:$0xff] }
  0xe9   : > { %1863 = vmatmul.mubr.bf16.gmra.mrb[8].mxu0 %v4460_v5  ;;  %2089 = vmatmul.mubr.bf16.gmra.mrb[8].mxu1 %v4460_v5  ;;  %v3901_v21 = vcombine.low %v265_v42, %v267_v14  ;;  %v3978_v5 = vcombine.high %v2279_v58, %v2281_v59 }
  0xea   : > { %1872 = vmatprep.mubr.bf16.mxu0 %v4461_v11  ;;  %2098 = vmatprep.mubr.bf16.mxu1 %v4461_v11  ;;  %v4478_v11 = vld [vmem:[%s5397_s1 + $0x38] ss:$12 sps:$4 sm:$0xff]  }
  0xeb   : > { %1932 = vmatpush1.bf16.msra.mxu0 %v3895_v3  ;;  %2158 = vmatpush1.bf16.msra.mxu1 %v4844_v62  ;;  %v3902_v62 = vcombine.high %v265_v42, %v267_v14  ;;  %v2283_v3 = vld [vmem:[%s4614_s25 + $0x158] sm:$0xff]  ;;  %v2288_v42 = vld [vmem:[%s4614_s25 + $0x1b0] sm:$0xff] }
  0xec   : > { %1933 = vmatprep.subr.bf16.mxu0 %v3898_v20  ;;  %2159 = vmatprep.subr.bf16.mxu1 %v4847_v1  ;;  %v2263_v1 = vld [vmem:[%s4614_s25 + $0x18] sm:$0xff] }
  0xed   : > { %v3961_v57 = vcombine.low %v2263_v1, %v2265_v24  ;;  %v2285_v20 = vld [vmem:[%s4614_s25 + $0x178] sm:$0xff] }
  0xee   : > { %v2287_v14 = vld [vmem:[%s4614_s25 + $0x198] sm:$0xff] }
  0xef   : > { %1934 = vmatpush1.bf16.msra.mxu0 %v3897_v28  ;;  %2160 = vmatpush1.bf16.msra.mxu1 %v4854_v18  ;;  %v4466_v18 = vld [vmem:[%s5397_s1 + $0x60] ss:$12 sps:$4 sm:$0xff]   ;;  %v3980_v28 = vcombine.high %v2282_v0, %v2284_v6 }
  0xf0   : > { %1935 = vmatprep.subr.bf16.mxu0 %v3900_v40  ;;  %2161 = vmatprep.subr.bf16.mxu1 %v4857_v25  ;;  %v3962_v25 = vcombine.high %v2263_v1, %v2265_v24  ;;  %v3982_v40 = vcombine.high %v2283_v3, %v2285_v20  ;;  %v2290_v1 = vld [vmem:[%s4614_s25 + $0x1d0] sm:$0xff] }
  0xf1   : > { %1873 = vmatmul.mubr.bf16.gmra.mrb[12].mxu0 %v4463_v32  ;;  %2099 = vmatmul.mubr.bf16.gmra.mrb[12].mxu1 %v4463_v32  ;;  %v2286_v32 = vld [vmem:[%s4614_s25 + $0x190] sm:$0xff] }
  0xf2   : > { %1882 = vmatprep.mubr.bf16.mxu0 %v4464_v16  ;;  %2108 = vmatprep.mubr.bf16.mxu1 %v4464_v16  ;;  %v2289_v16 = vld [vmem:[%s4614_s25 + $0x1b8] sm:$0xff]  ;;  %v3984_v19 = vcombine.high %v2286_v32, %v2288_v42  ;;  %v2292_v24 = vld [vmem:[%s4614_s25 + $0x1f0] sm:$0xff] }
  0xf3   : > { %1936 = vmatpush1.bf16.msra.mxu0 %v3899_v33  ;;  %2162 = vmatpush1.bf16.msra.mxu1 %v4870_v50  ;;  %v4469_v50 = vld [vmem:[%s5397_s1 + $0x78] ss:$12 sps:$4 sm:$0xff]   ;;  %v3979_v33 = vcombine.low %v2282_v0, %v2284_v6  ;;  %v3986_v41 = vcombine.high %v2287_v14, %v2289_v16  ;;  %v3987_v29 = vcombine.low %v2290_v1, %v2292_v24 }
  0xf4   : > { %1937 = vmatprep.subr.bf16.mxu0 %v3902_v62  ;;  %2163 = vmatprep.subr.bf16.mxu1 %v4873_v54  ;;  %v4470_v54 = vld [vmem:[%s5397_s1 + $0x94] ss:$12 sps:$4 sm:$0xff]   ;;  %v3981_v62 = vcombine.low %v2283_v3, %v2285_v20  ;;  %v2313_v0 = vld [vmem:[%s4614_s25 + $0x338] sm:$0xff] }
  0xf7   : > { %1938 = vmatpush1.bf16.msra.mxu0 %v3901_v21  ;;  %2164 = vmatpush1.bf16.msra.mxu1 %v4878_v8  ;;  %v4472_v8 = vld [vmem:[%s5397_s1 + $0x90] ss:$12 sps:$4 sm:$0xff]  }
  0xf8   : > { %2999 = vmatprep.subr.bf16.mxu0 %v3960_v26  ;;  %3225 = vmatprep.subr.bf16.mxu1 %v3962_v25  ;;  %v4479_v21 = vld [vmem:[%s5397_s1 + $0x50] ss:$12 sps:$4 sm:$0xff]   ;;  %v3983_v25 = vcombine.low %v2286_v32, %v2288_v42 }
  0xf9   : > { %1883 = vmatmul.mubr.bf16.gmra.mrb[16].mxu0 %v4466_v18  ;;  %2109 = vmatmul.mubr.bf16.gmra.mrb[16].mxu1 %v4466_v18  ;;  %v2291_v26 = vld [vmem:[%s4614_s25 + $0x1d8] sm:$0xff] }
  0xfa   : > { %1892 = vmatprep.mubr.bf16.mxu0 %v4467_v44  ;;  %2118 = vmatprep.mubr.bf16.mxu1 %v4467_v44  ;;  %v2293_v18 = vld [vmem:[%s4614_s25 + $0x1f8] sm:$0xff]  ;;  %v3985_v44 = vcombine.low %v2287_v14, %v2289_v16 }
  0xfb   : > { %v2317_v32 = vld [vmem:[%s4614_s25 + $0x378] sm:$0xff] }
 0x101   : > { %1893 = vmatmul.mubr.bf16.gmra.mrb[20].mxu0 %v4469_v50  ;;  %2119 = vmatmul.mubr.bf16.gmra.mrb[20].mxu1 %v4469_v50  ;;  %v3988_v50 = vcombine.high %v2290_v1, %v2292_v24  ;;  %v2321_v1 = vld [vmem:[%s4614_s25 + $0x3b8] sm:$0xff] }
 0x102   : > { %1902 = vmatprep.mubr.bf16.mxu0 %v4470_v54  ;;  %2128 = vmatprep.mubr.bf16.mxu1 %v4470_v54  ;;  %v3990_v54 = vcombine.high %v2291_v26, %v2293_v18 }
 0x109   : > { %1903 = vmatmul.mubr.bf16.gmra.mrb[24].mxu0 %v4472_v8  ;;  %2129 = vmatmul.mubr.bf16.gmra.mrb[24].mxu1 %v4472_v8  ;;  %v2294_v8 = vld [vmem:[%s4614_s25 + $0x210] sm:$0xff] }
 0x10a   : > { %1912 = vmatprep.mubr.bf16.mxu0 %v4473_v34  ;;  %2138 = vmatprep.mubr.bf16.mxu1 %v4473_v34  ;;  %v2296_v34 = vld [vmem:[%s4614_s25 + $0x230] sm:$0xff] }
 0x10b   : > { %v3992_v46 = vcombine.high %v2294_v8, %v2296_v34  ;;  %v3991_v9 = vcombine.low %v2294_v8, %v2296_v34  ;;  %v2325_v8 = vld [vmem:[%s4614_s25 + $0x3f8] sm:$0xff] }
 0x111   : > { %1913 = vmatmul.mubr.bf16.gmra.mrb[28].mxu0 %v4475_v38  ;;  %2139 = vmatmul.mubr.bf16.gmra.mrb[28].mxu1 %v4475_v38  ;;  %v2295_v38 = vld [vmem:[%s4614_s25 + $0x218] sm:$0xff] }
 0x112   : > { %1955 = vmatprep.mubr.bf16.mxu0 %v4556_v39  ;;  %2181 = vmatprep.mubr.bf16.mxu1 %v4556_v39  ;;  %v3994_v52 = vcombine.high %v2295_v38, %v2297_v27  ;;  %v3993_v37 = vcombine.low %v2295_v38, %v2297_v27 }
 0x119   : > { %1956 = vmatmul.mubr.bf16.vlgmr.msra.gmra.mrb[0].mxu0 %v4476_v47  ;;  %2182 = vmatmul.mubr.bf16.vlgmr.msra.gmra.mrb[0].mxu1 %v4476_v47  ;;  %v3989_v47 = vcombine.low %v2291_v26, %v2293_v18 }
 0x11a   : > { %3000 = vmatpush1.bf16.msra.mxu0 %v3959_v48  ;;  %3226 = vmatpush1.bf16.msra.mxu1 %v3961_v57  ;;  %v2298_v48 = vld [vmem:[%s4614_s25 + $0x250] sm:$0xff] }
 0x11b   : > { %3001 = vmatprep.subr.bf16.mxu0 %v3964_v56  ;;  %3227 = vmatprep.subr.bf16.mxu1 %v3966_v60  ;;  %v2300_v57 = vld [vmem:[%s4614_s25 + $0x270] sm:$0xff]  ;;  %v2299_v60 = vld [vmem:[%s4614_s25 + $0x258] sm:$0xff] }
 0x11c   : > { %1965 = vmatprep.mubr.bf16.mxu0 %v4556_v39  ;;  %2191 = vmatprep.mubr.bf16.mxu1 %v4556_v39  ;;  %v4480_v56 = vld [vmem:[%s5397_s1 + $0x68] ss:$12 sps:$4 sm:$0xff]   ;;  %v3996_v2 = vcombine.high %v2298_v48, %v2300_v57  ;;  %v3995_v22 = vcombine.low %v2298_v48, %v2300_v57  ;;  %v2327_v48 = vld [vmem:[%s4614_s25 + $0x418] sm:$0xff] }
 0x11d   : > { %v2329_v57 = vld [vmem:[%s4614_s25 + $0x438] sm:$0xff] }
 0x11e   : > { %3002 = vmatpush1.bf16.msra.mxu0 %v3963_v10  ;;  %3228 = vmatpush1.bf16.msra.mxu1 %v3965_v12  ;;  %v3998_v10 = vcombine.high %v2299_v60, %v2301_v35  ;;  %v2302_v12 = vld [vmem:[%s4614_s25 + $0x290] sm:$0xff] }
 0x11f   : > { %3003 = vmatprep.subr.bf16.mxu0 %v3968_v43  ;;  %3229 = vmatprep.subr.bf16.mxu1 %v3970_v45  ;;  %v2304_v43 = vld [vmem:[%s4614_s25 + $0x2b0] sm:$0xff]  ;;  %v2303_v45 = vld [vmem:[%s4614_s25 + $0x298] sm:$0xff] }
 0x120   : > { %v4000_v15 = vcombine.high %v2302_v12, %v2304_v43  ;;  %v4002_v23 = vcombine.high %v2303_v45, %v2305_v17  ;;  %v3999_v49 = vcombine.low %v2302_v12, %v2304_v43  ;;  %v4001_v58 = vcombine.low %v2303_v45, %v2305_v17  ;;  %v2331_v43 = vld [vmem:[%s4614_s25 + $0x458] sm:$0xff] }
 0x121   : > { %1966 = vmatmul.mubr.bf16.gmra.mrb[4].mxu0 %v4477_v13  ;;  %2192 = vmatmul.mubr.bf16.gmra.mrb[4].mxu1 %v4477_v13  ;;  %v3997_v13 = vcombine.low %v2299_v60, %v2301_v35  ;;  %v2333_v45 = vld [vmem:[%s4614_s25 + $0x478] sm:$0xff]  ;;  %v4025_v17 = vcombine.low %v2327_v48, %v2329_v57 }
 0x122   : > { %3004 = vmatpush1.bf16.msra.mxu0 %v3967_v31  ;;  %3230 = vmatpush1.bf16.msra.mxu1 %v3969_v36  ;;  %v2306_v31 = vld [vmem:[%s4614_s25 + $0x2d0] sm:$0xff] }
 0x123   : > { %3005 = vmatprep.subr.bf16.mxu0 %v3972_v51  ;;  %3231 = vmatprep.subr.bf16.mxu1 %v3974_v30  ;;  %v2308_v36 = vld [vmem:[%s4614_s25 + $0x2f0] sm:$0xff]  ;;  %v4481_v51 = vld [vmem:[%s5397_s1 + $0x80] ss:$12 sps:$4 sm:$0xff]   ;;  %v2307_v30 = vld [vmem:[%s4614_s25 + $0x2d8] sm:$0xff] }
 0x124   : > { %1975 = vmatprep.mubr.bf16.mxu0 %v4556_v39  ;;  %2201 = vmatprep.mubr.bf16.mxu1 %v4556_v39  ;;  %v4004_v59 = vcombine.high %v2306_v31, %v2308_v36  ;;  %v4003_v6 = vcombine.low %v2306_v31, %v2308_v36  ;;  %v4030_v31 = vcombine.high %v2331_v43, %v2333_v45  ;;  %v2335_v36 = vld [vmem:[%s4614_s25 + $0x498] sm:$0xff] }
 0x126   : > { %3006 = vmatpush1.bf16.msra.mxu0 %v3971_v61  ;;  %3232 = vmatpush1.bf16.msra.mxu1 %v3973_v55  ;;  %v4006_v61 = vcombine.high %v2307_v30, %v2309_v53  ;;  %v2310_v55 = vld [vmem:[%s4614_s25 + $0x310] sm:$0xff] }
 0x127   : > { %3007 = vmatprep.subr.bf16.mxu0 %v3976_v63  ;;  %3233 = vmatprep.subr.bf16.mxu1 %v3978_v5  ;;  %v2312_v63 = vld [vmem:[%s4614_s25 + $0x330] sm:$0xff]  ;;  %v2311_v5 = vld [vmem:[%s4614_s25 + $0x318] sm:$0xff] }
 0x128   : > { %v4008_v3 = vcombine.high %v2310_v55, %v2312_v63  ;;  %v4010_v20 = vcombine.high %v2311_v5, %v2313_v0  ;;  %v4007_v42 = vcombine.low %v2310_v55, %v2312_v63  ;;  %v4009_v14 = vcombine.low %v2311_v5, %v2313_v0  ;;  %v2340_v55 = vld [vmem:[%s4614_s25 + $0x4f0] sm:$0xff]  ;;  %v2339_v5 = vld [vmem:[%s4614_s25 + $0x4d8] sm:$0xff] }
 0x129   : > { %1976 = vmatmul.mubr.bf16.gmra.mrb[8].mxu0 %v4478_v11  ;;  %2202 = vmatmul.mubr.bf16.gmra.mrb[8].mxu1 %v4478_v11  ;;  %v4005_v11 = vcombine.low %v2307_v30, %v2309_v53  ;;  %v4029_v53 = vcombine.low %v2331_v43, %v2333_v45  ;;  %v4490_v63 = vld [vmem:[%s5397_s1 + $0x1b4] ss:$12 sps:$4 sm:$0xff]   ;;  %v2341_v0 = vld [vmem:[%s4614_s25 + $0x4f8] sm:$0xff] }
 0x12a   : > { %3008 = vmatpush1.bf16.msra.mxu0 %v3975_v4  ;;  %3234 = vmatpush1.bf16.msra.mxu1 %v3977_v7  ;;  %v2314_v4 = vld [vmem:[%s4614_s25 + $0x350] sm:$0xff]  ;;  %v4499_v43 = vld [vmem:[%s5397_s1 + $0x1fc] ss:$12 sps:$4 sm:$0xff]   ;;  %v4501_v45 = vld [vmem:[%s5397_s1 + $0x1f8] ss:$12 sps:$4 sm:$0xff]  }
 0x12b   : > { %3009 = vmatprep.subr.bf16.mxu0 %v3980_v28  ;;  %3235 = vmatprep.subr.bf16.mxu1 %v3982_v40  ;;  %v2316_v7 = vld [vmem:[%s4614_s25 + $0x370] sm:$0xff]  ;;  %v4482_v28 = vld [vmem:[%s5397_s1 + $0x98] ss:$12 sps:$4 sm:$0xff]  }
 0x12c   : > { %1985 = vmatprep.mubr.bf16.mxu0 %v4556_v39  ;;  %2211 = vmatprep.mubr.bf16.mxu1 %v4556_v39  ;;  %v2315_v40 = vld [vmem:[%s4614_s25 + $0x358] sm:$0xff]  ;;  %v4012_v16 = vcombine.high %v2314_v4, %v2316_v7  ;;  %v4011_v24 = vcombine.low %v2314_v4, %v2316_v7  ;;  %v2342_v4 = vld [vmem:[%s4614_s25 + $0x510] sm:$0xff] }
 0x12d   : > { %v2344_v7 = vld [vmem:[%s4614_s25 + $0x530] sm:$0xff] }
 0x12e   : > { %3010 = vmatpush1.bf16.msra.mxu0 %v3979_v33  ;;  %3236 = vmatpush1.bf16.msra.mxu1 %v3981_v62  ;;  %v4014_v33 = vcombine.high %v2315_v40, %v2317_v32  ;;  %v2318_v62 = vld [vmem:[%s4614_s25 + $0x390] sm:$0xff] }
 0x12f   : > { %3011 = vmatprep.subr.bf16.mxu0 %v3984_v19  ;;  %3237 = vmatprep.subr.bf16.mxu1 %v3986_v41  ;;  %v2320_v19 = vld [vmem:[%s4614_s25 + $0x3b0] sm:$0xff]  ;;  %v2319_v41 = vld [vmem:[%s4614_s25 + $0x398] sm:$0xff] }
 0x130   : > { %v4016_v26 = vcombine.high %v2318_v62, %v2320_v19  ;;  %v4018_v18 = vcombine.high %v2319_v41, %v2321_v1  ;;  %v4015_v34 = vcombine.low %v2318_v62, %v2320_v19  ;;  %v4017_v38 = vcombine.low %v2319_v41, %v2321_v1  ;;  %v2346_v62 = vld [vmem:[%s4614_s25 + $0x550] sm:$0xff]  ;;  %v4493_v41 = vld [vmem:[%s5397_s1 + $0x1cc] ss:$12 sps:$4 sm:$0xff]  }
 0x131   : > { %1986 = vmatmul.mubr.bf16.gmra.mrb[12].mxu0 %v4479_v21  ;;  %2212 = vmatmul.mubr.bf16.gmra.mrb[12].mxu1 %v4479_v21  ;;  %v4013_v21 = vcombine.low %v2315_v40, %v2317_v32  ;;  %v2345_v40 = vld [vmem:[%s4614_s25 + $0x538] sm:$0xff]  ;;  %v2348_v19 = vld [vmem:[%s4614_s25 + $0x570] sm:$0xff] }
 0x132   : > { %3012 = vmatpush1.bf16.msra.mxu0 %v3983_v25  ;;  %3238 = vmatpush1.bf16.msra.mxu1 %v3985_v44  ;;  %v2322_v25 = vld [vmem:[%s4614_s25 + $0x3d0] sm:$0xff]  ;;  %v2347_v1 = vld [vmem:[%s4614_s25 + $0x558] sm:$0xff] }
 0x133   : > { %3013 = vmatprep.subr.bf16.mxu0 %v3988_v50  ;;  %3239 = vmatprep.subr.bf16.mxu1 %v3990_v54  ;;  %v2324_v44 = vld [vmem:[%s4614_s25 + $0x3f0] sm:$0xff]  ;;  %v2323_v54 = vld [vmem:[%s4614_s25 + $0x3d8] sm:$0xff] }
 0x134   : > { %1995 = vmatprep.mubr.bf16.mxu0 %v4556_v39  ;;  %2221 = vmatprep.mubr.bf16.mxu1 %v4556_v39  ;;  %v4483_v50 = vld [vmem:[%s5397_s1 + $0xb0] ss:$12 sps:$4 sm:$0xff]   ;;  %v4020_v27 = vcombine.high %v2322_v25, %v2324_v44  ;;  %v4021_v60 = vcombine.low %v2323_v54, %v2325_v8 }
 0x136   : > { %3014 = vmatpush1.bf16.msra.mxu0 %v3987_v29  ;;  %3240 = vmatpush1.bf16.msra.mxu1 %v3989_v47  ;;  %v4022_v29 = vcombine.high %v2323_v54, %v2325_v8  ;;  %v4486_v47 = vld [vmem:[%s5397_s1 + $0x184] ss:$12 sps:$4 sm:$0xff]   ;;  %v2351_v54 = vld [vmem:[%s4614_s25 + $0x598] sm:$0xff] }
 0x137   : > { %3015 = vmatprep.subr.bf16.mxu0 %v3992_v46  ;;  %3241 = vmatprep.subr.bf16.mxu1 %v3994_v52  ;;  %v2326_v46 = vld [vmem:[%s4614_s25 + $0x410] sm:$0xff]  ;;  %v2353_v8 = vld [vmem:[%s4614_s25 + $0x5b8] sm:$0xff] }
 0x138   : > { %v2328_v52 = vld [vmem:[%s4614_s25 + $0x430] sm:$0xff] }
 0x139   : > { %1996 = vmatmul.mubr.bf16.gmra.mrb[16].mxu0 %v4480_v56  ;;  %2222 = vmatmul.mubr.bf16.gmra.mrb[16].mxu1 %v4480_v56  ;;  %v4019_v56 = vcombine.low %v2322_v25, %v2324_v44  ;;  %v4024_v35 = vcombine.high %v2326_v46, %v2328_v52  ;;  %v4023_v12 = vcombine.low %v2326_v46, %v2328_v52  ;;  %v2350_v44 = vld [vmem:[%s4614_s25 + $0x590] sm:$0xff] }
 0x13a   : > { %3016 = vmatpush1.bf16.msra.mxu0 %v3991_v9  ;;  %3242 = vmatpush1.bf16.msra.mxu1 %v3993_v37  ;;  %v4026_v9 = vcombine.high %v2327_v48, %v2329_v57  ;;  %v4484_v37 = vld [vmem:[%s5397_s1 + $0x180] ss:$12 sps:$4 sm:$0xff]   ;;  %v2354_v46 = vld [vmem:[%s4614_s25 + $0x5d0] sm:$0xff]  ;;  %v2355_v57 = vld [vmem:[%s4614_s25 + $0x5d8] sm:$0xff] }
 0x13b   : > { %3017 = vmatprep.subr.bf16.mxu0 %v3996_v2  ;;  %3243 = vmatprep.subr.bf16.mxu1 %v3998_v10  ;;  %v2330_v2 = vld [vmem:[%s4614_s25 + $0x450] sm:$0xff] }
 0x13c   : > { %2005 = vmatprep.mubr.bf16.mxu0 %v4556_v39  ;;  %2231 = vmatprep.mubr.bf16.mxu1 %v4556_v39  ;;  %v2332_v10 = vld [vmem:[%s4614_s25 + $0x470] sm:$0xff] }
 0x13d   : > { %v4027_v30 = vcombine.low %v2330_v2, %v2332_v10  ;;  %v2356_v52 = vld [vmem:[%s4614_s25 + $0x5f0] sm:$0xff] }
 0x13e   : > { %3018 = vmatpush1.bf16.msra.mxu0 %v3995_v22  ;;  %3244 = vmatpush1.bf16.msra.mxu1 %v3997_v13  ;;  %v4487_v22 = vld [vmem:[%s5397_s1 + $0x19c] ss:$12 sps:$4 sm:$0xff]   ;;  %v4028_v13 = vcombine.high %v2330_v2, %v2332_v10  ;;  %v4496_v48 = vld [vmem:[%s5397_s1 + $0x1e4] ss:$12 sps:$4 sm:$0xff]   ;;  %v4051_v2 = vcombine.low %v2354_v46, %v2356_v52 }
 0x13f   : > { %3019 = vmatprep.subr.bf16.mxu0 %v4000_v15  ;;  %3245 = vmatprep.subr.bf16.mxu1 %v4002_v23  ;;  %v2334_v15 = vld [vmem:[%s4614_s25 + $0x490] sm:$0xff] }
 0x140   : > { %v2336_v23 = vld [vmem:[%s4614_s25 + $0x4b0] sm:$0xff] }
 0x141   : > { %2006 = vmatmul.mubr.bf16.gmra.mrb[20].mxu0 %v4481_v51  ;;  %2232 = vmatmul.mubr.bf16.gmra.mrb[20].mxu1 %v4481_v51  ;;  %v2337_v51 = vld [vmem:[%s4614_s25 + $0x4b8] sm:$0xff] }
 0x142   : > { %3020 = vmatpush1.bf16.msra.mxu0 %v3999_v49  ;;  %3246 = vmatpush1.bf16.msra.mxu1 %v4001_v58  ;;  %v4032_v49 = vcombine.high %v2334_v15, %v2336_v23  ;;  %v4034_v58 = vcombine.high %v2335_v36, %v2337_v51 }
 0x143   : > { %3021 = vmatprep.subr.bf16.mxu0 %v4004_v59  ;;  %3247 = vmatprep.subr.bf16.mxu1 %v4006_v61  ;;  %v4489_v59 = vld [vmem:[%s5397_s1 + $0x198] ss:$12 sps:$4 sm:$0xff]   ;;  %v2338_v61 = vld [vmem:[%s4614_s25 + $0x4d0] sm:$0xff] }
 0x144   : > { %2015 = vmatprep.mubr.bf16.mxu0 %v4556_v39  ;;  %2241 = vmatprep.mubr.bf16.mxu1 %v4556_v39  ;;  %v4035_v32 = vcombine.low %v2338_v61, %v2340_v55 }
 0x146   : > { %3022 = vmatpush1.bf16.msra.mxu0 %v4003_v6  ;;  %3248 = vmatpush1.bf16.msra.mxu1 %v4005_v11  ;;  %v4031_v6 = vcombine.low %v2334_v15, %v2336_v23  ;;  %v4033_v11 = vcombine.low %v2335_v36, %v2337_v51  ;;  %v4507_v15 = vld [vmem:[%s5397_s1 + $0x228] ss:$12 sps:$4 sm:$0xff]   ;;  %v4510_v36 = vld [vmem:[%s5397_s1 + $0x1b8] ss:$12 sps:$4 sm:$0xff]   ;;  %v4511_v51 = vld [vmem:[%s5397_s1 + $0x1d0] ss:$12 sps:$4 sm:$0xff]  }
 0x147   : > { %3023 = vmatprep.subr.bf16.mxu0 %v4008_v3  ;;  %3249 = vmatprep.subr.bf16.mxu1 %v4010_v20  ;;  %v4036_v3 = vcombine.high %v2338_v61, %v2340_v55  ;;  %v4038_v20 = vcombine.high %v2339_v5, %v2341_v0  ;;  %v4508_v23 = vld [vmem:[%s5397_s1 + $0x188] ss:$12 sps:$4 sm:$0xff]  }
 0x149   : > { %2016 = vmatmul.mubr.bf16.gmra.mrb[24].mxu0 %v4482_v28  ;;  %2242 = vmatmul.mubr.bf16.gmra.mrb[24].mxu1 %v4482_v28  ;;  %v2343_v28 = vld [vmem:[%s4614_s25 + $0x518] sm:$0xff] }
 0x14a   : > { %3024 = vmatpush1.bf16.msra.mxu0 %v4007_v42  ;;  %3250 = vmatpush1.bf16.msra.mxu1 %v4009_v14  ;;  %v4037_v42 = vcombine.low %v2339_v5, %v2341_v0  ;;  %v4040_v14 = vcombine.high %v2342_v4, %v2344_v7 }
 0x14b   : > { %3025 = vmatprep.subr.bf16.mxu0 %v4012_v16  ;;  %3251 = vmatprep.subr.bf16.mxu1 %v4014_v33  ;;  %v4492_v16 = vld [vmem:[%s5397_s1 + $0x1b0] ss:$12 sps:$4 sm:$0xff]   ;;  %v4042_v33 = vcombine.high %v2343_v28, %v2345_v40 }
 0x14c   : > { %2025 = vmatprep.mubr.bf16.mxu0 %v4556_v39  ;;  %2251 = vmatprep.mubr.bf16.mxu1 %v4556_v39 }
 0x14e   : > { %3026 = vmatpush1.bf16.msra.mxu0 %v4011_v24  ;;  %3252 = vmatpush1.bf16.msra.mxu1 %v4013_v21  ;;  %v2349_v24 = vld [vmem:[%s4614_s25 + $0x578] sm:$0xff]  ;;  %v4039_v21 = vcombine.low %v2342_v4, %v2344_v7 }
 0x14f   : > { %3027 = vmatprep.subr.bf16.mxu0 %v4016_v26  ;;  %3253 = vmatprep.subr.bf16.mxu1 %v4018_v18  ;;  %v4041_v26 = vcombine.low %v2343_v28, %v2345_v40  ;;  %v4044_v18 = vcombine.high %v2346_v62, %v2348_v19  ;;  %v4046_v25 = vcombine.high %v2347_v1, %v2349_v24 }
 0x151   : > { %2026 = vmatmul.mubr.bf16.gmra.mrb[28].mxu0 %v4483_v50  ;;  %2252 = vmatmul.mubr.bf16.gmra.mrb[28].mxu1 %v4483_v50  ;;  %v2352_v50 = vld [vmem:[%s4614_s25 + $0x5b0] sm:$0xff] }
 0x152   : > { %3028 = vmatpush1.bf16.msra.mxu0 %v4015_v34  ;;  %3254 = vmatpush1.bf16.msra.mxu1 %v4017_v38  ;;  %v4043_v34 = vcombine.low %v2346_v62, %v2348_v19  ;;  %v4045_v38 = vcombine.low %v2347_v1, %v2349_v24 }
 0x153   : > { %3029 = vmatprep.subr.bf16.mxu0 %v4020_v27  ;;  %3255 = vmatprep.subr.bf16.mxu1 %v4022_v29  ;;  %v4048_v27 = vcombine.high %v2350_v44, %v2352_v50  ;;  %v4495_v29 = vld [vmem:[%s5397_s1 + $0x1c8] ss:$12 sps:$4 sm:$0xff]  }
 0x154   : > { %3031 = vmatprep.mubr.bf16.mxu0 %v4486_v47  ;;  %3257 = vmatprep.mubr.bf16.mxu1 %v4486_v47  ;;  %v4050_v47 = vcombine.high %v2351_v54, %v2353_v8 }
 0x156   : > { %3030 = vmatpush1.bf16.msra.mxu0 %v4019_v56  ;;  %3256 = vmatpush1.bf16.msra.mxu1 %v4021_v60  ;;  %v2357_v56 = vld [vmem:[%s4614_s25 + $0x5f8] sm:$0xff]  ;;  %v4047_v60 = vcombine.low %v2350_v44, %v2352_v50 }
 0x157   : > { %3112 = vmatprep.subr.bf16.mxu0 %v4024_v35  ;;  %3338 = vmatprep.subr.bf16.mxu1 %v4026_v9  ;;  %v4049_v35 = vcombine.low %v2351_v54, %v2353_v8  ;;  %v4052_v9 = vcombine.high %v2354_v46, %v2356_v52  ;;  %v4053_v10 = vcombine.low %v2355_v57, %v2357_v56 }
 0x159   : > { %3032 = vmatmul.mubr.bf16.vlgmr.msra.gmra.mrb[0].mxu0 %v4484_v37  ;;  %3258 = vmatmul.mubr.bf16.vlgmr.msra.gmra.mrb[0].mxu1 %v4484_v37  ;;  %v4054_v37 = vcombine.high %v2355_v57, %v2357_v56 }
 0x15a   : > { %3113 = vmatpush1.bf16.msra.mxu0 %v4023_v12  ;;  %3339 = vmatpush1.bf16.msra.mxu1 %v4025_v17  ;;  %v4498_v12 = vld [vmem:[%s5397_s1 + $0x1e0] ss:$12 sps:$4 sm:$0xff]  }
 0x15b   : > { %3041 = vmatprep.mubr.bf16.mxu0 %v4487_v22  ;;  %3267 = vmatprep.mubr.bf16.mxu1 %v4487_v22  ;;  %v4502_v17 = vld [vmem:[%s5397_s1 + $0x214] ss:$12 sps:$4 sm:$0xff]   ;;  %v4504_v22 = vld [vmem:[%s5397_s1 + $0x210] ss:$12 sps:$4 sm:$0xff]  }
 0x15c   : > { %3114 = vmatprep.subr.bf16.mxu0 %v4028_v13  ;;  %3340 = vmatprep.subr.bf16.mxu1 %v4030_v31  ;;  %v4505_v13 = vld [vmem:[%s5397_s1 + $0x22c] ss:$12 sps:$4 sm:$0xff]  }
 0x15d   : > { %v4509_v31 = vld [vmem:[%s5397_s1 + $0x1a0] ss:$12 sps:$4 sm:$0xff]  }
 0x15e   : > { %3115 = vmatpush1.bf16.msra.mxu0 %v4027_v30  ;;  %3341 = vmatpush1.bf16.msra.mxu1 %v4029_v53  ;;  %v4512_v30 = vld [vmem:[%s5397_s1 + $0x1e8] ss:$12 sps:$4 sm:$0xff]   ;;  %v4513_v53 = vld [vmem:[%s5397_s1 + $0x200] ss:$12 sps:$4 sm:$0xff]  }
 0x15f   : > { %3116 = vmatprep.subr.bf16.mxu0 %v4032_v49  ;;  %3342 = vmatprep.subr.bf16.mxu1 %v4034_v58  ;;  %v4514_v49 = vld [vmem:[%s5397_s1 + $0x218] ss:$12 sps:$4 sm:$0xff]   ;;  %v4515_v58 = vld [vmem:[%s5397_s1 + $0x230] ss:$12 sps:$4 sm:$0xff]  }
 0x161   : > { %3042 = vmatmul.mubr.bf16.gmra.mrb[4].mxu0 %v4489_v59  ;;  %3268 = vmatmul.mubr.bf16.gmra.mrb[4].mxu1 %v4489_v59 }
 0x162   : > { %3051 = vmatprep.mubr.bf16.mxu0 %v4490_v63  ;;  %3277 = vmatprep.mubr.bf16.mxu1 %v4490_v63 }
 0x163   : > { %3117 = vmatpush1.bf16.msra.mxu0 %v4031_v6  ;;  %3343 = vmatpush1.bf16.msra.mxu1 %v4033_v11 }
 0x164   : > { %3118 = vmatprep.subr.bf16.mxu0 %v4036_v3  ;;  %3344 = vmatprep.subr.bf16.mxu1 %v4038_v20 }
 0x167   : > { %3119 = vmatpush1.bf16.msra.mxu0 %v4035_v32  ;;  %3345 = vmatpush1.bf16.msra.mxu1 %v4037_v42 }
 0x168   : > { %3120 = vmatprep.subr.bf16.mxu0 %v4040_v14  ;;  %3346 = vmatprep.subr.bf16.mxu1 %v4042_v33 }
 0x169   : > { %3052 = vmatmul.mubr.bf16.gmra.mrb[8].mxu0 %v4492_v16  ;;  %3278 = vmatmul.mubr.bf16.gmra.mrb[8].mxu1 %v4492_v16 }
 0x16a   : > { %3061 = vmatprep.mubr.bf16.mxu0 %v4493_v41  ;;  %3287 = vmatprep.mubr.bf16.mxu1 %v4493_v41 }
 0x16b   : > { %3121 = vmatpush1.bf16.msra.mxu0 %v4039_v21  ;;  %3347 = vmatpush1.bf16.msra.mxu1 %v4041_v26 }
 0x16c   : > { %3122 = vmatprep.subr.bf16.mxu0 %v4044_v18  ;;  %3348 = vmatprep.subr.bf16.mxu1 %v4046_v25 }
 0x16f   : > { %3123 = vmatpush1.bf16.msra.mxu0 %v4043_v34  ;;  %3349 = vmatpush1.bf16.msra.mxu1 %v4045_v38 }
 0x170   : > { %3124 = vmatprep.subr.bf16.mxu0 %v4048_v27  ;;  %3350 = vmatprep.subr.bf16.mxu1 %v4050_v47 }
 0x171   : > { %3062 = vmatmul.mubr.bf16.gmra.mrb[12].mxu0 %v4495_v29  ;;  %3288 = vmatmul.mubr.bf16.gmra.mrb[12].mxu1 %v4495_v29 }
 0x172   : > { %3071 = vmatprep.mubr.bf16.mxu0 %v4496_v48  ;;  %3297 = vmatprep.mubr.bf16.mxu1 %v4496_v48 }
 0x173   : > { %3125 = vmatpush1.bf16.msra.mxu0 %v4047_v60  ;;  %3351 = vmatpush1.bf16.msra.mxu1 %v4049_v35 }
 0x174   : > { %3126 = vmatprep.subr.bf16.mxu0 %v4052_v9  ;;  %3352 = vmatprep.subr.bf16.mxu1 %v4054_v37 }
 0x177   : > { %3127 = vmatpush1.bf16.msra.mxu0 %v4051_v2  ;;  %3353 = vmatpush1.bf16.msra.mxu1 %v4053_v10 }
 0x179   : > { %3072 = vmatmul.mubr.bf16.gmra.mrb[16].mxu0 %v4498_v12  ;;  %3298 = vmatmul.mubr.bf16.gmra.mrb[16].mxu1 %v4498_v12 }
 0x17a   : > { %3081 = vmatprep.mubr.bf16.mxu0 %v4499_v43  ;;  %3307 = vmatprep.mubr.bf16.mxu1 %v4499_v43 }
 0x181   : > { %3082 = vmatmul.mubr.bf16.gmra.mrb[20].mxu0 %v4501_v45  ;;  %3308 = vmatmul.mubr.bf16.gmra.mrb[20].mxu1 %v4501_v45 }
 0x182   : > { %3091 = vmatprep.mubr.bf16.mxu0 %v4502_v17  ;;  %3317 = vmatprep.mubr.bf16.mxu1 %v4502_v17 }
 0x189   : > { %3092 = vmatmul.mubr.bf16.gmra.mrb[24].mxu0 %v4504_v22  ;;  %3318 = vmatmul.mubr.bf16.gmra.mrb[24].mxu1 %v4504_v22 }
 0x18a   : > { %3101 = vmatprep.mubr.bf16.mxu0 %v4505_v13  ;;  %3327 = vmatprep.mubr.bf16.mxu1 %v4505_v13 }
 0x191   : > { %3102 = vmatmul.mubr.bf16.gmra.mrb[28].mxu0 %v4507_v15  ;;  %3328 = vmatmul.mubr.bf16.gmra.mrb[28].mxu1 %v4507_v15 }
 0x192   : > { %3144 = vmatprep.mubr.bf16.mxu0 %v4556_v39  ;;  %3370 = vmatprep.mubr.bf16.mxu1 %v4556_v39 }
 0x199   : > { %3145 = vmatmul.mubr.bf16.vlgmr.msra.gmra.mrb[0].mxu0 %v4508_v23  ;;  %3371 = vmatmul.mubr.bf16.vlgmr.msra.gmra.mrb[0].mxu1 %v4508_v23 }
 0x19a   : > { %3154 = vmatprep.mubr.bf16.mxu0 %v4556_v39  ;;  %3380 = vmatprep.mubr.bf16.mxu1 %v4556_v39 }
 0x1a1   : > { %3155 = vmatmul.mubr.bf16.gmra.mrb[4].mxu0 %v4509_v31  ;;  %3381 = vmatmul.mubr.bf16.gmra.mrb[4].mxu1 %v4509_v31 }
 0x1a2   : > { %3164 = vmatprep.mubr.bf16.mxu0 %v4556_v39  ;;  %3390 = vmatprep.mubr.bf16.mxu1 %v4556_v39 }
 0x1a9   : > { %3165 = vmatmul.mubr.bf16.gmra.mrb[8].mxu0 %v4510_v36  ;;  %3391 = vmatmul.mubr.bf16.gmra.mrb[8].mxu1 %v4510_v36 }
 0x1aa   : > { %3174 = vmatprep.mubr.bf16.mxu0 %v4556_v39  ;;  %3400 = vmatprep.mubr.bf16.mxu1 %v4556_v39 }
 0x1b1   : > { %3175 = vmatmul.mubr.bf16.gmra.mrb[12].mxu0 %v4511_v51  ;;  %3401 = vmatmul.mubr.bf16.gmra.mrb[12].mxu1 %v4511_v51 }
 0x1b2   : > { %3184 = vmatprep.mubr.bf16.mxu0 %v4556_v39  ;;  %3410 = vmatprep.mubr.bf16.mxu1 %v4556_v39 }
 0x1b9   : > { %3185 = vmatmul.mubr.bf16.gmra.mrb[16].mxu0 %v4512_v30  ;;  %3411 = vmatmul.mubr.bf16.gmra.mrb[16].mxu1 %v4512_v30 }
 0x1ba   : > { %3194 = vmatprep.mubr.bf16.mxu0 %v4556_v39  ;;  %3420 = vmatprep.mubr.bf16.mxu1 %v4556_v39 }
 0x1c1   : > { %3195 = vmatmul.mubr.bf16.gmra.mrb[20].mxu0 %v4513_v53  ;;  %3421 = vmatmul.mubr.bf16.gmra.mrb[20].mxu1 %v4513_v53 }
 0x1c2   : > { %3204 = vmatprep.mubr.bf16.mxu0 %v4556_v39  ;;  %3430 = vmatprep.mubr.bf16.mxu1 %v4556_v39 }
 0x1c9   : > { %3205 = vmatmul.mubr.bf16.gmra.mrb[24].mxu0 %v4514_v49  ;;  %3431 = vmatmul.mubr.bf16.gmra.mrb[24].mxu1 %v4514_v49 }
 0x1ca   : > { %3214 = vmatprep.mubr.bf16.mxu0 %v4556_v39  ;;  %3440 = vmatprep.mubr.bf16.mxu1 %v4556_v39 }
 0x1d1   : > { %3215 = vmatmul.mubr.bf16.gmra.mrb[28].mxu0 %v4515_v58  ;;  %3441 = vmatmul.mubr.bf16.gmra.mrb[28].mxu1 %v4515_v58 }
 0x26c   : > { %v3146_v39 = vpop.f32.mrb[0].mxu0  ;;  %v3372_v59 = vpop.f32.mrb[0].mxu1 }
 0x26d   : > { %3515 = vst [vmem:[%s5315_s4] sm:$0xff] %v3146_v39  ;;  %v3148_v61 = vpop.f32.mrb[1].mxu0  ;;  %3517 = vst [vmem:[%s5315_s4 + $0x10] sm:$0xff] %v3372_v59  ;;  %v3374_v55 = vpop.f32.mrb[1].mxu1 }
 0x26e   : > { %3516 = vst [vmem:[%s5315_s4 + $0x8] sm:$0xff] %v3148_v61  ;;  %v3150_v63 = vpop.f32.mrb[2].mxu0  ;;  %3518 = vst [vmem:[%s5315_s4 + $0x18] sm:$0xff] %v3374_v55  ;;  %v3376_v5 = vpop.f32.mrb[2].mxu1 }
 0x26f   : > { %3519 = vst [vmem:[%s5315_s4 + $0x20] sm:$0xff] %v3150_v63  ;;  %v3152_v0 = vpop.f32.mrb[3].mxu0  ;;  %3521 = vst [vmem:[%s5315_s4 + $0x30] sm:$0xff] %v3376_v5  ;;  %v3378_v6 = vpop.f32.mrb[3].mxu1 }
 0x270   : > { %3520 = vst [vmem:[%s5315_s4 + $0x28] sm:$0xff] %v3152_v0  ;;  %3522 = vst [vmem:[%s5315_s4 + $0x38] sm:$0xff] %v3378_v6 }
 0x274   : > { %v3156_v11 = vpop.f32.mrb[4].mxu0  ;;  %v3382_v3 = vpop.f32.mrb[4].mxu1 }
 0x275   : > { %3523 = vst [vmem:[%s5315_s4 + $0x40] sm:$0xff] %v3156_v11  ;;  %v3158_v20 = vpop.f32.mrb[5].mxu0  ;;  %3525 = vst [vmem:[%s5315_s4 + $0x50] sm:$0xff] %v3382_v3  ;;  %v3384_v4 = vpop.f32.mrb[5].mxu1 }
 0x276   : > { %3524 = vst [vmem:[%s5315_s4 + $0x48] sm:$0xff] %v3158_v20  ;;  %v3160_v7 = vpop.f32.mrb[6].mxu0  ;;  %3526 = vst [vmem:[%s5315_s4 + $0x58] sm:$0xff] %v3384_v4  ;;  %v3386_v28 = vpop.f32.mrb[6].mxu1 }
 0x277   : > { %3527 = vst [vmem:[%s5315_s4 + $0x60] sm:$0xff] %v3160_v7  ;;  %v3162_v40 = vpop.f32.mrb[7].mxu0  ;;  %3529 = vst [vmem:[%s5315_s4 + $0x70] sm:$0xff] %v3386_v28  ;;  %v3388_v32 = vpop.f32.mrb[7].mxu1 }
 0x278   : > { %3528 = vst [vmem:[%s5315_s4 + $0x68] sm:$0xff] %v3162_v40  ;;  %3530 = vst [vmem:[%s5315_s4 + $0x78] sm:$0xff] %v3388_v32 }
 0x27c   : > { %v3166_v42 = vpop.f32.mrb[8].mxu0  ;;  %v3392_v14 = vpop.f32.mrb[8].mxu1 }
 0x27d   : > { %3531 = vst [vmem:[%s5315_s4 + $0x80] sm:$0xff] %v3166_v42  ;;  %v3168_v16 = vpop.f32.mrb[9].mxu0  ;;  %3533 = vst [vmem:[%s5315_s4 + $0x90] sm:$0xff] %v3392_v14  ;;  %v3394_v33 = vpop.f32.mrb[9].mxu1 }
 0x27e   : > { %3532 = vst [vmem:[%s5315_s4 + $0x88] sm:$0xff] %v3168_v16  ;;  %v3170_v62 = vpop.f32.mrb[10].mxu0  ;;  %3534 = vst [vmem:[%s5315_s4 + $0x98] sm:$0xff] %v3394_v33  ;;  %v3396_v19 = vpop.f32.mrb[10].mxu1 }
 0x27f   : > { %3535 = vst [vmem:[%s5315_s4 + $0xa0] sm:$0xff] %v3170_v62  ;;  %v3172_v41 = vpop.f32.mrb[11].mxu0  ;;  %3537 = vst [vmem:[%s5315_s4 + $0xb0] sm:$0xff] %v3396_v19  ;;  %v3398_v1 = vpop.f32.mrb[11].mxu1 }
 0x280   : > { %3536 = vst [vmem:[%s5315_s4 + $0xa8] sm:$0xff] %v3172_v41  ;;  %3538 = vst [vmem:[%s5315_s4 + $0xb8] sm:$0xff] %v3398_v1 }
 0x284   : > { %v3176_v24 = vpop.f32.mrb[12].mxu0  ;;  %v3402_v21 = vpop.f32.mrb[12].mxu1 }
 0x285   : > { %3539 = vst [vmem:[%s5315_s4 + $0xc0] sm:$0xff] %v3176_v24  ;;  %v3178_v26 = vpop.f32.mrb[13].mxu0  ;;  %3541 = vst [vmem:[%s5315_s4 + $0xd0] sm:$0xff] %v3402_v21  ;;  %v3404_v18 = vpop.f32.mrb[13].mxu1 }
 0x286   : > { %3540 = vst [vmem:[%s5315_s4 + $0xc8] sm:$0xff] %v3178_v26  ;;  %v3180_v25 = vpop.f32.mrb[14].mxu0  ;;  %3542 = vst [vmem:[%s5315_s4 + $0xd8] sm:$0xff] %v3404_v18  ;;  %v3406_v44 = vpop.f32.mrb[14].mxu1 }
 0x287   : > { %3543 = vst [vmem:[%s5315_s4 + $0xe0] sm:$0xff] %v3180_v25  ;;  %v3182_v50 = vpop.f32.mrb[15].mxu0  ;;  %3545 = vst [vmem:[%s5315_s4 + $0xf0] sm:$0xff] %v3406_v44  ;;  %v3408_v54 = vpop.f32.mrb[15].mxu1 }
 0x288   : > { %3544 = vst [vmem:[%s5315_s4 + $0xe8] sm:$0xff] %v3182_v50  ;;  %3546 = vst [vmem:[%s5315_s4 + $0xf8] sm:$0xff] %v3408_v54 }
 0x28c   : > { %v3186_v8 = vpop.f32.mrb[16].mxu0  ;;  %v3412_v34 = vpop.f32.mrb[16].mxu1 }
 0x28d   : > { %3547 = vst [vmem:[%s5315_s4 + $0x100] sm:$0xff] %v3186_v8  ;;  %v3188_v38 = vpop.f32.mrb[17].mxu0  ;;  %3549 = vst [vmem:[%s5315_s4 + $0x110] sm:$0xff] %v3412_v34  ;;  %v3414_v27 = vpop.f32.mrb[17].mxu1 }
 0x28e   : > { %3548 = vst [vmem:[%s5315_s4 + $0x108] sm:$0xff] %v3188_v38  ;;  %v3190_v29 = vpop.f32.mrb[18].mxu0  ;;  %3550 = vst [vmem:[%s5315_s4 + $0x118] sm:$0xff] %v3414_v27  ;;  %v3416_v47 = vpop.f32.mrb[18].mxu1 }
 0x28f   : > { %3551 = vst [vmem:[%s5315_s4 + $0x120] sm:$0xff] %v3190_v29  ;;  %v3192_v46 = vpop.f32.mrb[19].mxu0  ;;  %3553 = vst [vmem:[%s5315_s4 + $0x130] sm:$0xff] %v3416_v47  ;;  %v3418_v52 = vpop.f32.mrb[19].mxu1 }
 0x290   : > { %3552 = vst [vmem:[%s5315_s4 + $0x128] sm:$0xff] %v3192_v46  ;;  %3554 = vst [vmem:[%s5315_s4 + $0x138] sm:$0xff] %v3418_v52 }
 0x294   : > { %v3196_v48 = vpop.f32.mrb[20].mxu0  ;;  %v3422_v57 = vpop.f32.mrb[20].mxu1 }
 0x295   : > { %3555 = vst [vmem:[%s5315_s4 + $0x140] sm:$0xff] %v3196_v48  ;;  %v3198_v56 = vpop.f32.mrb[21].mxu0  ;;  %3557 = vst [vmem:[%s5315_s4 + $0x150] sm:$0xff] %v3422_v57  ;;  %v3424_v60 = vpop.f32.mrb[21].mxu1 }
 0x296   : > { %3556 = vst [vmem:[%s5315_s4 + $0x148] sm:$0xff] %v3198_v56  ;;  %v3200_v35 = vpop.f32.mrb[22].mxu0  ;;  %3558 = vst [vmem:[%s5315_s4 + $0x158] sm:$0xff] %v3424_v60  ;;  %v3426_v9 = vpop.f32.mrb[22].mxu1 }
 0x297   : > { %3559 = vst [vmem:[%s5315_s4 + $0x160] sm:$0xff] %v3200_v35  ;;  %v3202_v37 = vpop.f32.mrb[23].mxu0  ;;  %3561 = vst [vmem:[%s5315_s4 + $0x170] sm:$0xff] %v3426_v9  ;;  %v3428_v2 = vpop.f32.mrb[23].mxu1 }
 0x298   : > { %3560 = vst [vmem:[%s5315_s4 + $0x168] sm:$0xff] %v3202_v37  ;;  %3562 = vst [vmem:[%s5315_s4 + $0x178] sm:$0xff] %v3428_v2 }
 0x29c   : > { %v3206_v10 = vpop.f32.mrb[24].mxu0  ;;  %v3432_v12 = vpop.f32.mrb[24].mxu1 }
 0x29d   : > { %3563 = vst [vmem:[%s5315_s4 + $0x180] sm:$0xff] %v3206_v10  ;;  %v3208_v43 = vpop.f32.mrb[25].mxu0  ;;  %3565 = vst [vmem:[%s5315_s4 + $0x190] sm:$0xff] %v3432_v12  ;;  %v3434_v45 = vpop.f32.mrb[25].mxu1 }
 0x29e   : > { %3564 = vst [vmem:[%s5315_s4 + $0x188] sm:$0xff] %v3208_v43  ;;  %v3210_v17 = vpop.f32.mrb[26].mxu0  ;;  %3566 = vst [vmem:[%s5315_s4 + $0x198] sm:$0xff] %v3434_v45  ;;  %v3436_v22 = vpop.f32.mrb[26].mxu1 }
 0x29f   : > { %3567 = vst [vmem:[%s5315_s4 + $0x1a0] sm:$0xff] %v3210_v17  ;;  %v3212_v13 = vpop.f32.mrb[27].mxu0  ;;  %3569 = vst [vmem:[%s5315_s4 + $0x1b0] sm:$0xff] %v3436_v22  ;;  %v3438_v15 = vpop.f32.mrb[27].mxu1 }
 0x2a0   : > { %3568 = vst [vmem:[%s5315_s4 + $0x1a8] sm:$0xff] %v3212_v13  ;;  %3570 = vst [vmem:[%s5315_s4 + $0x1b8] sm:$0xff] %v3438_v15 }
 0x2a4   : > { %v3216_v23 = vpop.f32.mrb[28].mxu0  ;;  %v3442_v31 = vpop.f32.mrb[28].mxu1 }
 0x2a5   : > { %3571 = vst [vmem:[%s5315_s4 + $0x1c0] sm:$0xff] %v3216_v23  ;;  %v3218_v36 = vpop.f32.mrb[29].mxu0  ;;  %3573 = vst [vmem:[%s5315_s4 + $0x1d0] sm:$0xff] %v3442_v31  ;;  %v3444_v51 = vpop.f32.mrb[29].mxu1 }
 0x2a6   : > { %3572 = vst [vmem:[%s5315_s4 + $0x1c8] sm:$0xff] %v3218_v36  ;;  %v3220_v30 = vpop.f32.mrb[30].mxu0  ;;  %3574 = vst [vmem:[%s5315_s4 + $0x1d8] sm:$0xff] %v3444_v51  ;;  %v3446_v53 = vpop.f32.mrb[30].mxu1 }
 0x2a7   : > { %3575 = vst [vmem:[%s5315_s4 + $0x1e0] sm:$0xff] %v3220_v30  ;;  %v3222_v49 = vpop.f32.mrb[31].mxu0  ;;  %3577 = vst [vmem:[%s5315_s4 + $0x1f0] sm:$0xff] %v3446_v53  ;;  %v3448_v58 = vpop.f32.mrb[31].mxu1 }
 0x2a8   : > { %3576 = vst [vmem:[%s5315_s4 + $0x1e8] sm:$0xff] %v3222_v49  ;;  %3578 = vst [vmem:[%s5315_s4 + $0x1f8] sm:$0xff] %v3448_v58 }
 0x2a9 PF: > { %s12_s13 = sadd.s32 1, %s4554_s13   ;;  %s5399_s9 = smov %s4546_s11 }
 0x2aa   : > { %p9_p7 = scmp.ge.s32.totalorder %s12_s13, 10   ;;  %s5400_s10 = smov %s4550_s12 }
 0x2ab   : > { %s5401_s11 = smov %s5404_s14  ;;  %s5402_s12 = smov %s5408_s15 }
 0x2ac   :  { %11 = sbr.rel (!%p9_p7) target bundleno = 3 (0x3), region = 61 }

</bundles_post_ra>
